<compile_context>
chip_gen: v5e
topology: v5e:2x2
jax: 0.10.0
libtpu: 0.0.40
codegen_flags: <defaults>
</compile_context>

<pallas_src>
from functools import partial

import numpy as np

import jax
import jax.numpy as jnp
from jax import lax
from jax.experimental import pallas as pl
from jax.experimental.pallas import tpu as pltpu


# ----------------------------------------------------------------------------
# Kernel
# ----------------------------------------------------------------------------
def _imu_lstm_kernel(perm_ref, x_ref, lstm_ref, head_ref, out_ref,
                     *, seq_len, batch, hidden, input_dim, num_classes,
                     lstm_off, head_off):
    T, B, H, D = seq_len, batch, hidden, input_dim
    G = 4 * H
    f32, bf16 = jnp.float32, jnp.bfloat16

    # ---------- hoisted one-time work (off the serial recurrence path) ------
    # batch-major (B*T, D) -> time-major (T*B, D) via one tiny MXU dot against
    # a constant 0/1 permutation matrix (exact in bf16). Replaces the previous
    # host-side transpose dispatch.
    x_tm = jnp.dot(perm_ref[...], x_ref[...].astype(bf16),
                   preferred_element_type=f32).astype(bf16)              # (T*B, D)

    wih = lstm_ref[lstm_off["wih"]:lstm_off["wih"] + D, :].astype(bf16)  # (D, 4H)
    whh = lstm_ref[lstm_off["whh"]:lstm_off["whh"] + H, :].astype(bf16)  # (H, 4H)
    b_g = lstm_ref[lstm_off["b"]:lstm_off["b"] + 1, :]                   # (1, 4H) f32

    # Whole-sequence input projection: one MXU pass for all T steps.
    gx = jnp.dot(x_tm, wih, preferred_element_type=f32) + b_g            # (T*B, 4H)

    # Lane constants merging sigmoid(i,f,o) and tanh(g) into ONE EUP pass:
    # tanh(x) = 2*sigmoid(2x) - 1  ->  g block gets pre/post scale 2, offset -1.
    lane = lax.broadcasted_iota(jnp.int32, (1, G), 1)
    is_g = jnp.logical_and(lane >= 2 * H, lane < 3 * H)
    pre_scale = jnp.where(is_g, 2.0, 1.0).astype(f32)   # also the post-scale
    post_off = jnp.where(is_g, -1.0, 0.0).astype(f32)

    h = jnp.zeros((B, H), f32)
    c = jnp.zeros((B, H), f32)

    # ---------------- serial LSTM recurrence (PyTorch i, f, g, o order) -----
    # T is tiny and static -> statically unrolled; every gx slice is one
    # aligned 8-sublane block.  W_hh is loop-invariant across the unrolled
    # steps (RHS can stay staged in the MXU).
    # TODO(synk): if T grows beyond ~32, switch to lax.fori_loop carrying
    # (h, c) with gx in a VMEM scratch and pl.ds slicing to bound live ranges.
    for t in range(T):
        g = gx[t * B:(t + 1) * B, :] + jnp.dot(
            h.astype(bf16), whh, preferred_element_type=f32)             # (B, 4H)
        # one full-vreg EUP exp (+ approx reciprocal) covers all four gates
        act = pl.reciprocal(1.0 + jnp.exp(-(g * pre_scale)), approx=True)
        gates = act * pre_scale + post_off
        i_g = gates[:, 0 * H:1 * H]
        f_g = gates[:, 1 * H:2 * H]
        g_g = gates[:, 2 * H:3 * H]
        o_g = gates[:, 3 * H:4 * H]
        c = f_g * c + i_g * g_g
        h = o_g * jnp.tanh(c)

    # -------- body MLP -> (eval-mode) dropout -> classifier -> log_softmax --
    def linear(v, w_name, w_rows, b_name):
        w = head_ref[head_off[w_name]:head_off[w_name] + w_rows, :].astype(bf16)
        bb = head_ref[head_off[b_name]:head_off[b_name] + 1, :]
        return jnp.dot(v.astype(bf16), w, preferred_element_type=f32) + bb

    W = head_ref.shape[1]   # padded head width (>= latent and num_classes)
    y = jnp.maximum(linear(h, "wb1", H, "bb1"), 0.0)
    y = jnp.maximum(linear(y, "wb2", W, "bb2"), 0.0)
    z = jnp.maximum(linear(y, "wc1", W, "bc1"), 0.0)
    z = jnp.maximum(linear(z, "wc2", W, "bc2"), 0.0)
    logits = linear(z, "wc3", W, "bc3")[:, :num_classes]

    m = jnp.max(logits, axis=1, keepdims=True)
    lse = jnp.log(jnp.sum(jnp.exp(logits - m), axis=1, keepdims=True)) + m
    out_ref[...] = (logits - lse).astype(out_ref.dtype)


# ----------------------------------------------------------------------------
# Wrapper
# ----------------------------------------------------------------------------
def _time_major_perm(batch, seq_len):
    """0/1 matrix P with (P @ x_batch_major)[t*B + b] == x[b, t, :]."""
    n = batch * seq_len
    p = np.zeros((n, n), np.float32)
    i = np.arange(n)
    p[i, (i % batch) * seq_len + (i // batch)] = 1.0
    return p


def imu_lstm_forward(x_btd, packed, meta):
    """x_btd: (B, T, input_dim) float32, batch-first like the PyTorch module."""
    B, T, D = x_btd.shape
    H, NC = meta["hidden"], meta["num_classes"]

    # Free bitcast; time-major relayout happens inside the kernel.
    x2 = x_btd.reshape(B * T, D)
    perm = jnp.asarray(_time_major_perm(B, T), dtype=jnp.bfloat16)  # HLO constant

    kernel = partial(
        _imu_lstm_kernel,
        seq_len=T, batch=B, hidden=H, input_dim=D, num_classes=NC,
        lstm_off=meta["lstm_off"], head_off=meta["head_off"])

    # Single kernel invocation, no grid: every operand (a few tens of KB)
    # lives fully in VMEM for the duration of the call.
    n_in = 4
    return pl.pallas_call(
        kernel,
        out_shape=jax.ShapeDtypeStruct((B, NC), jnp.float32),
        in_specs=[pl.BlockSpec(memory_space=pltpu.MemorySpace.VMEM)
                  for _ in range(n_in)],
        out_specs=pl.BlockSpec(memory_space=pltpu.MemorySpace.VMEM),
    )(perm, x2, packed["lstm_slab"], packed["head_slab"])


# ----------------------------------------------------------------------------
# Parameter construction / packing
# ----------------------------------------------------------------------------
def init_params(key, input_dim, hidden, latent, num_classes):
    ks = jax.random.split(key, 16)
    s = 0.1

    def rnd(k, shape):
        return (s * jax.random.normal(k, shape)).astype(jnp.float32)

    # LSTM (PyTorch stores W_ih: (4H, D), W_hh: (4H, H); we pass transposed)
    w_ih = rnd(ks[0], (4 * hidden, input_dim))
    w_hh = rnd(ks[1], (4 * hidden, hidden))
    b_ih = rnd(ks[2], (4 * hidden,))
    b_hh = rnd(ks[3], (4 * hidden,))
    # body
    wb1 = rnd(ks[4], (latent, hidden)); bb1 = rnd(ks[5], (latent,))
    wb2 = rnd(ks[6], (latent, latent)); bb2 = rnd(ks[7], (latent,))
    # classifier
    wc1 = rnd(ks[8], (latent, latent)); bc1 = rnd(ks[9], (latent,))
    wc2 = rnd(ks[10], (latent, latent)); bc2 = rnd(ks[11], (latent,))
    wc3 = rnd(ks[12], (num_classes, latent)); bc3 = rnd(ks[13], (num_classes,))

    return {
        "wih_t": w_ih.T, "whh_t": w_hh.T,
        "b_lstm": (b_ih + b_hh).reshape(1, 4 * hidden),
        "wb1_t": wb1.T, "bb1": bb1.reshape(1, latent),
        "wb2_t": wb2.T, "bb2": bb2.reshape(1, latent),
        "wc1_t": wc1.T, "bc1": bc1.reshape(1, latent),
        "wc2_t": wc2.T, "bc2": bc2.reshape(1, latent),
        "wc3_t": wc3.T, "bc3": bc3.reshape(1, num_classes),
    }


def _pack_rows(blocks, width, align=8):
    """Row-stack 2D arrays into one slab; each block starts on an 8-aligned row."""
    offs, pieces, r = {}, [], 0
    for name, a in blocks:
        a = np.asarray(a, np.float32)
        r = ((r + align - 1) // align) * align
        offs[name] = r
        pieces.append((r, a))
        r += a.shape[0]
    slab = np.zeros((r, width), np.float32)
    for off, a in pieces:
        slab[off:off + a.shape[0], :a.shape[1]] = a
    return jnp.asarray(slab), offs


def pack_params(raw, input_dim, hidden, latent, num_classes):
    H = hidden
    W = max(latent, num_classes)          # padded head width

    lstm_slab, lstm_off = _pack_rows(
        [("wih", raw["wih_t"]), ("whh", raw["whh_t"]), ("b", raw["b_lstm"])],
        width=4 * H)

    def padw(a, rows):
        a = np.asarray(a, np.float32)
        out = np.zeros((rows, W), np.float32)
        out[:a.shape[0], :a.shape[1]] = a
        return out

    head_slab, head_off = _pack_rows(
        [("wb1", padw(raw["wb1_t"], H)),
         ("wb2", padw(raw["wb2_t"], W)),
         ("wc1", padw(raw["wc1_t"], W)),
         ("wc2", padw(raw["wc2_t"], W)),
         ("wc3", padw(raw["wc3_t"], W)),
         ("bb1", padw(raw["bb1"], 1)),
         ("bb2", padw(raw["bb2"], 1)),
         ("bc1", padw(raw["bc1"], 1)),
         ("bc2", padw(raw["bc2"], 1)),
         ("bc3", padw(raw["bc3"], 1))],
        width=W)

    meta = dict(input_dim=input_dim, hidden=H, latent=latent,
                num_classes=num_classes, head_width=W,
                lstm_off=lstm_off, head_off=head_off)
    return {"lstm_slab": lstm_slab, "head_slab": head_slab}, meta


# ----------------------------------------------------------------------------
# Pure-JAX reference (matches the PyTorch forward, eval mode)
# ----------------------------------------------------------------------------
def reference_forward(x_btd, params):
    B, T, D = x_btd.shape
    H = params["whh_t"].shape[0]

    def cell(carry, x_t):
        h, c = carry
        gates = x_t @ params["wih_t"] + h @ params["whh_t"] + params["b_lstm"]
        i = jax.nn.sigmoid(gates[:, 0 * H:1 * H])
        f = jax.nn.sigmoid(gates[:, 1 * H:2 * H])
        g = jnp.tanh(gates[:, 2 * H:3 * H])
        o = jax.nn.sigmoid(gates[:, 3 * H:4 * H])
        c = f * c + i * g
        h = o * jnp.tanh(c)
        return (h, c), None

    h0 = jnp.zeros((B, H), jnp.float32)
    (h, _), _ = lax.scan(cell, (h0, h0), jnp.transpose(x_btd, (1, 0, 2)))
    y = jnp.maximum(h @ params["wb1_t"] + params["bb1"], 0.0)
    y = jnp.maximum(y @ params["wb2_t"] + params["bb2"], 0.0)
    z = jnp.maximum(y @ params["wc1_t"] + params["bc1"], 0.0)
    z = jnp.maximum(z @ params["wc2_t"] + params["bc2"], 0.0)
    logits = z @ params["wc3_t"] + params["bc3"]
    return jax.nn.log_softmax(logits, axis=1)


# ----------------------------------------------------------------------------
if __name__ == "__main__":
    B, T, D = 8, 10, 6          # batch, timesteps, IMU measurement channels
    H, LATENT, NUM_CLASSES = 32, 32, 10

    key = jax.random.PRNGKey(0)
    k_x, k_p = jax.random.split(key)
    x = jax.random.normal(k_x, (B, T, D), dtype=jnp.float32)

    raw = init_params(k_p, D, H, LATENT, NUM_CLASSES)
    packed, meta = pack_params(raw, D, H, LATENT, NUM_CLASSES)

    fwd = jax.jit(lambda xx, pp: imu_lstm_forward(xx, pp, meta))
    out = jax.block_until_ready(fwd(x, packed))

    ref = reference_forward(x, raw)
    assert out.shape == (B, NUM_CLASSES)
    # bf16 MXU inputs (per perf review) -> tolerance relaxed vs f32 reference.
    assert jnp.allclose(out, ref, atol=1e-2, rtol=1e-2), \
        "mismatch vs pure-JAX reference"

    print("KERNEL_OK")
</pallas_src>

<mosaic_0001>
module attributes {stable_mosaic.version = 11 : i64} {
  func.func @_imu_lstm_kernel(%arg0: memref<80x80xbf16, #tpu.memory_space<vmem>>, %arg1: memref<80x6xf32, #tpu.memory_space<vmem>>, %arg2: memref<41x128xf32, #tpu.memory_space<vmem>>, %arg3: memref<193x32xf32, #tpu.memory_space<vmem>>, %arg4: memref<8x10xf32, #tpu.memory_space<vmem>>) attributes {dimension_semantics = [], scalar_prefetch = 0 : i64, scratch_operands = 0 : i64, tpu.core_type = #tpu.core_type<tc>} {
    %c0 = arith.constant 0 : index
    %c0_0 = arith.constant 0 : index
    %0 = vector.load %arg0[%c0, %c0_0] : memref<80x80xbf16, #tpu.memory_space<vmem>>, vector<80x80xbf16>
    %c0_1 = arith.constant 0 : index
    %c0_2 = arith.constant 0 : index
    %1 = vector.load %arg1[%c0_1, %c0_2] : memref<80x6xf32, #tpu.memory_space<vmem>>, vector<80x6xf32>
    %2 = arith.truncf %1 : vector<80x6xf32> to vector<80x6xbf16>
    %cst = arith.constant dense<0.000000e+00> : vector<80x6xf32>
    %3 = tpu.matmul %0, %2, %cst {dimension_numbers = #tpu.dot_dimension_numbers<[1], [0], [0], [1], [0, 0, 1, 1], [], []>} : vector<80x80xbf16>, vector<80x6xbf16>, vector<80x6xf32> -> vector<80x6xf32>
    %4 = arith.truncf %3 : vector<80x6xf32> to vector<80x6xbf16>
    %c0_3 = arith.constant 0 : index
    %c0_4 = arith.constant 0 : index
    %5 = vector.load %arg2[%c0_3, %c0_4] : memref<41x128xf32, #tpu.memory_space<vmem>>, vector<6x128xf32>
    %6 = arith.truncf %5 : vector<6x128xf32> to vector<6x128xbf16>
    %c8 = arith.constant 8 : index
    %c0_5 = arith.constant 0 : index
    %7 = vector.load %arg2[%c8, %c0_5] : memref<41x128xf32, #tpu.memory_space<vmem>>, vector<32x128xf32>
    %8 = arith.truncf %7 : vector<32x128xf32> to vector<32x128xbf16>
    %c40 = arith.constant 40 : index
    %c0_6 = arith.constant 0 : index
    %9 = vector.load %arg2[%c40, %c0_6] : memref<41x128xf32, #tpu.memory_space<vmem>>, vector<1x128xf32>
    %cst_7 = arith.constant dense<0.000000e+00> : vector<80x128xf32>
    %10 = tpu.matmul %4, %6, %cst_7 {dimension_numbers = #tpu.dot_dimension_numbers<[1], [0], [0], [1], [0, 0, 1, 1], [], []>} : vector<80x6xbf16>, vector<6x128xbf16>, vector<80x128xf32> -> vector<80x128xf32>
    %11 = vector.broadcast %9 : vector<1x128xf32> to vector<80x128xf32>
    %12 = arith.addf %10, %11 : vector<80x128xf32>
    %13 = tpu.iota {dimensions = array<i32: 1>} : vector<1x128xi32>
    %c64_i32 = arith.constant 64 : i32
    %14 = vector.broadcast %c64_i32 : i32 to vector<1x128xi32>
    %15 = arith.cmpi sge, %13, %14 : vector<1x128xi32>
    %c96_i32 = arith.constant 96 : i32
    %16 = vector.broadcast %c96_i32 : i32 to vector<1x128xi32>
    %17 = arith.cmpi slt, %13, %16 : vector<1x128xi32>
    %18 = arith.andi %15, %17 : vector<1x128xi1>
    %cst_8 = arith.constant 2.000000e+00 : f32
    %cst_9 = arith.constant 1.000000e+00 : f32
    %19 = vector.broadcast %cst_8 : f32 to vector<1x128xf32>
    %20 = vector.broadcast %cst_9 : f32 to vector<1x128xf32>
    %21 = arith.select %18, %19, %20 : vector<1x128xi1>, vector<1x128xf32>
    %cst_10 = arith.constant -1.000000e+00 : f32
    %cst_11 = arith.constant 0.000000e+00 : f32
    %22 = vector.broadcast %cst_10 : f32 to vector<1x128xf32>
    %23 = vector.broadcast %cst_11 : f32 to vector<1x128xf32>
    %24 = arith.select %18, %22, %23 : vector<1x128xi1>, vector<1x128xf32>
    %cst_12 = arith.constant 0.000000e+00 : f32
    %25 = vector.broadcast %cst_12 : f32 to vector<8x32xf32>
    %cst_13 = arith.constant 0.000000e+00 : f32
    %26 = vector.broadcast %cst_13 : f32 to vector<8x32xf32>
    %27 = vector.extract_strided_slice %12 {offsets = [0, 0], sizes = [8, 128], strides = [1, 1]} : vector<80x128xf32> to vector<8x128xf32>
    %28 = arith.truncf %25 : vector<8x32xf32> to vector<8x32xbf16>
    %cst_14 = arith.constant dense<0.000000e+00> : vector<8x128xf32>
    %29 = tpu.matmul %28, %8, %cst_14 {dimension_numbers = #tpu.dot_dimension_numbers<[1], [0], [0], [1], [0, 0, 1, 1], [], []>} : vector<8x32xbf16>, vector<32x128xbf16>, vector<8x128xf32> -> vector<8x128xf32>
    %30 = arith.addf %27, %29 : vector<8x128xf32>
    %31 = vector.broadcast %21 : vector<1x128xf32> to vector<8x128xf32>
    %32 = arith.mulf %30, %31 : vector<8x128xf32>
    %cst_15 = arith.constant 0.000000e+00 : f32
    %33 = vector.broadcast %cst_15 : f32 to vector<8x128xf32>
    %34 = arith.subf %33, %32 : vector<8x128xf32>
    %35 = math.exp %34 : vector<8x128xf32>
    %cst_16 = arith.constant 1.000000e+00 : f32
    %36 = vector.broadcast %cst_16 : f32 to vector<8x128xf32>
    %37 = arith.addf %36, %35 : vector<8x128xf32>
    %38 = tpu.reciprocal %37 {approx = true} : vector<8x128xf32> -> vector<8x128xf32>
    %39 = vector.broadcast %21 : vector<1x128xf32> to vector<8x128xf32>
    %40 = arith.mulf %38, %39 : vector<8x128xf32>
    %41 = vector.broadcast %24 : vector<1x128xf32> to vector<8x128xf32>
    %42 = arith.addf %40, %41 : vector<8x128xf32>
    %43 = vector.extract_strided_slice %42 {offsets = [0, 0], sizes = [8, 32], strides = [1, 1]} : vector<8x128xf32> to vector<8x32xf32>
    %44 = vector.extract_strided_slice %42 {offsets = [0, 32], sizes = [8, 32], strides = [1, 1]} : vector<8x128xf32> to vector<8x32xf32>
    %45 = vector.extract_strided_slice %42 {offsets = [0, 64], sizes = [8, 32], strides = [1, 1]} : vector<8x128xf32> to vector<8x32xf32>
    %46 = vector.extract_strided_slice %42 {offsets = [0, 96], sizes = [8, 32], strides = [1, 1]} : vector<8x128xf32> to vector<8x32xf32>
    %47 = arith.mulf %44, %26 : vector<8x32xf32>
    %48 = arith.mulf %43, %45 : vector<8x32xf32>
    %49 = arith.addf %47, %48 : vector<8x32xf32>
    %50 = math.tanh %49 : vector<8x32xf32>
    %51 = arith.mulf %46, %50 : vector<8x32xf32>
    %52 = vector.extract_strided_slice %12 {offsets = [8, 0], sizes = [8, 128], strides = [1, 1]} : vector<80x128xf32> to vector<8x128xf32>
    %53 = arith.truncf %51 : vector<8x32xf32> to vector<8x32xbf16>
    %cst_17 = arith.constant dense<0.000000e+00> : vector<8x128xf32>
    %54 = tpu.matmul %53, %8, %cst_17 {dimension_numbers = #tpu.dot_dimension_numbers<[1], [0], [0], [1], [0, 0, 1, 1], [], []>} : vector<8x32xbf16>, vector<32x128xbf16>, vector<8x128xf32> -> vector<8x128xf32>
    %55 = arith.addf %52, %54 : vector<8x128xf32>
    %56 = vector.broadcast %21 : vector<1x128xf32> to vector<8x128xf32>
    %57 = arith.mulf %55, %56 : vector<8x128xf32>
    %cst_18 = arith.constant 0.000000e+00 : f32
    %58 = vector.broadcast %cst_18 : f32 to vector<8x128xf32>
    %59 = arith.subf %58, %57 : vector<8x128xf32>
    %60 = math.exp %59 : vector<8x128xf32>
    %cst_19 = arith.constant 1.000000e+00 : f32
    %61 = vector.broadcast %cst_19 : f32 to vector<8x128xf32>
    %62 = arith.addf %61, %60 : vector<8x128xf32>
    %63 = tpu.reciprocal %62 {approx = true} : vector<8x128xf32> -> vector<8x128xf32>
    %64 = vector.broadcast %21 : vector<1x128xf32> to vector<8x128xf32>
    %65 = arith.mulf %63, %64 : vector<8x128xf32>
    %66 = vector.broadcast %24 : vector<1x128xf32> to vector<8x128xf32>
    %67 = arith.addf %65, %66 : vector<8x128xf32>
    %68 = vector.extract_strided_slice %67 {offsets = [0, 0], sizes = [8, 32], strides = [1, 1]} : vector<8x128xf32> to vector<8x32xf32>
    %69 = vector.extract_strided_slice %67 {offsets = [0, 32], sizes = [8, 32], strides = [1, 1]} : vector<8x128xf32> to vector<8x32xf32>
    %70 = vector.extract_strided_slice %67 {offsets = [0, 64], sizes = [8, 32], strides = [1, 1]} : vector<8x128xf32> to vector<8x32xf32>
    %71 = vector.extract_strided_slice %67 {offsets = [0, 96], sizes = [8, 32], strides = [1, 1]} : vector<8x128xf32> to vector<8x32xf32>
    %72 = arith.mulf %69, %49 : vector<8x32xf32>
    %73 = arith.mulf %68, %70 : vector<8x32xf32>
    %74 = arith.addf %72, %73 : vector<8x32xf32>
    %75 = math.tanh %74 : vector<8x32xf32>
    %76 = arith.mulf %71, %75 : vector<8x32xf32>
    %77 = vector.extract_strided_slice %12 {offsets = [16, 0], sizes = [8, 128], strides = [1, 1]} : vector<80x128xf32> to vector<8x128xf32>
    %78 = arith.truncf %76 : vector<8x32xf32> to vector<8x32xbf16>
    %cst_20 = arith.constant dense<0.000000e+00> : vector<8x128xf32>
    %79 = tpu.matmul %78, %8, %cst_20 {dimension_numbers = #tpu.dot_dimension_numbers<[1], [0], [0], [1], [0, 0, 1, 1], [], []>} : vector<8x32xbf16>, vector<32x128xbf16>, vector<8x128xf32> -> vector<8x128xf32>
    %80 = arith.addf %77, %79 : vector<8x128xf32>
    %81 = vector.broadcast %21 : vector<1x128xf32> to vector<8x128xf32>
    %82 = arith.mulf %80, %81 : vector<8x128xf32>
    %cst_21 = arith.constant 0.000000e+00 : f32
    %83 = vector.broadcast %cst_21 : f32 to vector<8x128xf32>
    %84 = arith.subf %83, %82 : vector<8x128xf32>
    %85 = math.exp %84 : vector<8x128xf32>
    %cst_22 = arith.constant 1.000000e+00 : f32
    %86 = vector.broadcast %cst_22 : f32 to vector<8x128xf32>
    %87 = arith.addf %86, %85 : vector<8x128xf32>
    %88 = tpu.reciprocal %87 {approx = true} : vector<8x128xf32> -> vector<8x128xf32>
    %89 = vector.broadcast %21 : vector<1x128xf32> to vector<8x128xf32>
    %90 = arith.mulf %88, %89 : vector<8x128xf32>
    %91 = vector.broadcast %24 : vector<1x128xf32> to vector<8x128xf32>
    %92 = arith.addf %90, %91 : vector<8x128xf32>
    %93 = vector.extract_strided_slice %92 {offsets = [0, 0], sizes = [8, 32], strides = [1, 1]} : vector<8x128xf32> to vector<8x32xf32>
    %94 = vector.extract_strided_slice %92 {offsets = [0, 32], sizes = [8, 32], strides = [1, 1]} : vector<8x128xf32> to vector<8x32xf32>
    %95 = vector.extract_strided_slice %92 {offsets = [0, 64], sizes = [8, 32], strides = [1, 1]} : vector<8x128xf32> to vector<8x32xf32>
    %96 = vector.extract_strided_slice %92 {offsets = [0, 96], sizes = [8, 32], strides = [1, 1]} : vector<8x128xf32> to vector<8x32xf32>
    %97 = arith.mulf %94, %74 : vector<8x32xf32>
    %98 = arith.mulf %93, %95 : vector<8x32xf32>
    %99 = arith.addf %97, %98 : vector<8x32xf32>
    %100 = math.tanh %99 : vector<8x32xf32>
    %101 = arith.mulf %96, %100 : vector<8x32xf32>
    %102 = vector.extract_strided_slice %12 {offsets = [24, 0], sizes = [8, 128], strides = [1, 1]} : vector<80x128xf32> to vector<8x128xf32>
    %103 = arith.truncf %101 : vector<8x32xf32> to vector<8x32xbf16>
    %cst_23 = arith.constant dense<0.000000e+00> : vector<8x128xf32>
    %104 = tpu.matmul %103, %8, %cst_23 {dimension_numbers = #tpu.dot_dimension_numbers<[1], [0], [0], [1], [0, 0, 1, 1], [], []>} : vector<8x32xbf16>, vector<32x128xbf16>, vector<8x128xf32> -> vector<8x128xf32>
    %105 = arith.addf %102, %104 : vector<8x128xf32>
    %106 = vector.broadcast %21 : vector<1x128xf32> to vector<8x128xf32>
    %107 = arith.mulf %105, %106 : vector<8x128xf32>
    %cst_24 = arith.constant 0.000000e+00 : f32
    %108 = vector.broadcast %cst_24 : f32 to vector<8x128xf32>
    %109 = arith.subf %108, %107 : vector<8x128xf32>
    %110 = math.exp %109 : vector<8x128xf32>
    %cst_25 = arith.constant 1.000000e+00 : f32
    %111 = vector.broadcast %cst_25 : f32 to vector<8x128xf32>
    %112 = arith.addf %111, %110 : vector<8x128xf32>
    %113 = tpu.reciprocal %112 {approx = true} : vector<8x128xf32> -> vector<8x128xf32>
    %114 = vector.broadcast %21 : vector<1x128xf32> to vector<8x128xf32>
    %115 = arith.mulf %113, %114 : vector<8x128xf32>
    %116 = vector.broadcast %24 : vector<1x128xf32> to vector<8x128xf32>
    %117 = arith.addf %115, %116 : vector<8x128xf32>
    %118 = vector.extract_strided_slice %117 {offsets = [0, 0], sizes = [8, 32], strides = [1, 1]} : vector<8x128xf32> to vector<8x32xf32>
    %119 = vector.extract_strided_slice %117 {offsets = [0, 32], sizes = [8, 32], strides = [1, 1]} : vector<8x128xf32> to vector<8x32xf32>
    %120 = vector.extract_strided_slice %117 {offsets = [0, 64], sizes = [8, 32], strides = [1, 1]} : vector<8x128xf32> to vector<8x32xf32>
    %121 = vector.extract_strided_slice %117 {offsets = [0, 96], sizes = [8, 32], strides = [1, 1]} : vector<8x128xf32> to vector<8x32xf32>
    %122 = arith.mulf %119, %99 : vector<8x32xf32>
    %123 = arith.mulf %118, %120 : vector<8x32xf32>
    %124 = arith.addf %122, %123 : vector<8x32xf32>
    %125 = math.tanh %124 : vector<8x32xf32>
    %126 = arith.mulf %121, %125 : vector<8x32xf32>
    %127 = vector.extract_strided_slice %12 {offsets = [32, 0], sizes = [8, 128], strides = [1, 1]} : vector<80x128xf32> to vector<8x128xf32>
    %128 = arith.truncf %126 : vector<8x32xf32> to vector<8x32xbf16>
    %cst_26 = arith.constant dense<0.000000e+00> : vector<8x128xf32>
    %129 = tpu.matmul %128, %8, %cst_26 {dimension_numbers = #tpu.dot_dimension_numbers<[1], [0], [0], [1], [0, 0, 1, 1], [], []>} : vector<8x32xbf16>, vector<32x128xbf16>, vector<8x128xf32> -> vector<8x128xf32>
    %130 = arith.addf %127, %129 : vector<8x128xf32>
    %131 = vector.broadcast %21 : vector<1x128xf32> to vector<8x128xf32>
    %132 = arith.mulf %130, %131 : vector<8x128xf32>
    %cst_27 = arith.constant 0.000000e+00 : f32
    %133 = vector.broadcast %cst_27 : f32 to vector<8x128xf32>
    %134 = arith.subf %133, %132 : vector<8x128xf32>
    %135 = math.exp %134 : vector<8x128xf32>
    %cst_28 = arith.constant 1.000000e+00 : f32
    %136 = vector.broadcast %cst_28 : f32 to vector<8x128xf32>
    %137 = arith.addf %136, %135 : vector<8x128xf32>
    %138 = tpu.reciprocal %137 {approx = true} : vector<8x128xf32> -> vector<8x128xf32>
    %139 = vector.broadcast %21 : vector<1x128xf32> to vector<8x128xf32>
    %140 = arith.mulf %138, %139 : vector<8x128xf32>
    %141 = vector.broadcast %24 : vector<1x128xf32> to vector<8x128xf32>
    %142 = arith.addf %140, %141 : vector<8x128xf32>
    %143 = vector.extract_strided_slice %142 {offsets = [0, 0], sizes = [8, 32], strides = [1, 1]} : vector<8x128xf32> to vector<8x32xf32>
    %144 = vector.extract_strided_slice %142 {offsets = [0, 32], sizes = [8, 32], strides = [1, 1]} : vector<8x128xf32> to vector<8x32xf32>
    %145 = vector.extract_strided_slice %142 {offsets = [0, 64], sizes = [8, 32], strides = [1, 1]} : vector<8x128xf32> to vector<8x32xf32>
    %146 = vector.extract_strided_slice %142 {offsets = [0, 96], sizes = [8, 32], strides = [1, 1]} : vector<8x128xf32> to vector<8x32xf32>
    %147 = arith.mulf %144, %124 : vector<8x32xf32>
    %148 = arith.mulf %143, %145 : vector<8x32xf32>
    %149 = arith.addf %147, %148 : vector<8x32xf32>
    %150 = math.tanh %149 : vector<8x32xf32>
    %151 = arith.mulf %146, %150 : vector<8x32xf32>
    %152 = vector.extract_strided_slice %12 {offsets = [40, 0], sizes = [8, 128], strides = [1, 1]} : vector<80x128xf32> to vector<8x128xf32>
    %153 = arith.truncf %151 : vector<8x32xf32> to vector<8x32xbf16>
    %cst_29 = arith.constant dense<0.000000e+00> : vector<8x128xf32>
    %154 = tpu.matmul %153, %8, %cst_29 {dimension_numbers = #tpu.dot_dimension_numbers<[1], [0], [0], [1], [0, 0, 1, 1], [], []>} : vector<8x32xbf16>, vector<32x128xbf16>, vector<8x128xf32> -> vector<8x128xf32>
    %155 = arith.addf %152, %154 : vector<8x128xf32>
    %156 = vector.broadcast %21 : vector<1x128xf32> to vector<8x128xf32>
    %157 = arith.mulf %155, %156 : vector<8x128xf32>
    %cst_30 = arith.constant 0.000000e+00 : f32
    %158 = vector.broadcast %cst_30 : f32 to vector<8x128xf32>
    %159 = arith.subf %158, %157 : vector<8x128xf32>
    %160 = math.exp %159 : vector<8x128xf32>
    %cst_31 = arith.constant 1.000000e+00 : f32
    %161 = vector.broadcast %cst_31 : f32 to vector<8x128xf32>
    %162 = arith.addf %161, %160 : vector<8x128xf32>
    %163 = tpu.reciprocal %162 {approx = true} : vector<8x128xf32> -> vector<8x128xf32>
    %164 = vector.broadcast %21 : vector<1x128xf32> to vector<8x128xf32>
    %165 = arith.mulf %163, %164 : vector<8x128xf32>
    %166 = vector.broadcast %24 : vector<1x128xf32> to vector<8x128xf32>
    %167 = arith.addf %165, %166 : vector<8x128xf32>
    %168 = vector.extract_strided_slice %167 {offsets = [0, 0], sizes = [8, 32], strides = [1, 1]} : vector<8x128xf32> to vector<8x32xf32>
    %169 = vector.extract_strided_slice %167 {offsets = [0, 32], sizes = [8, 32], strides = [1, 1]} : vector<8x128xf32> to vector<8x32xf32>
    %170 = vector.extract_strided_slice %167 {offsets = [0, 64], sizes = [8, 32], strides = [1, 1]} : vector<8x128xf32> to vector<8x32xf32>
    %171 = vector.extract_strided_slice %167 {offsets = [0, 96], sizes = [8, 32], strides = [1, 1]} : vector<8x128xf32> to vector<8x32xf32>
    %172 = arith.mulf %169, %149 : vector<8x32xf32>
    %173 = arith.mulf %168, %170 : vector<8x32xf32>
    %174 = arith.addf %172, %173 : vector<8x32xf32>
    %175 = math.tanh %174 : vector<8x32xf32>
    %176 = arith.mulf %171, %175 : vector<8x32xf32>
    %177 = vector.extract_strided_slice %12 {offsets = [48, 0], sizes = [8, 128], strides = [1, 1]} : vector<80x128xf32> to vector<8x128xf32>
    %178 = arith.truncf %176 : vector<8x32xf32> to vector<8x32xbf16>
    %cst_32 = arith.constant dense<0.000000e+00> : vector<8x128xf32>
    %179 = tpu.matmul %178, %8, %cst_32 {dimension_numbers = #tpu.dot_dimension_numbers<[1], [0], [0], [1], [0, 0, 1, 1], [], []>} : vector<8x32xbf16>, vector<32x128xbf16>, vector<8x128xf32> -> vector<8x128xf32>
    %180 = arith.addf %177, %179 : vector<8x128xf32>
    %181 = vector.broadcast %21 : vector<1x128xf32> to vector<8x128xf32>
    %182 = arith.mulf %180, %181 : vector<8x128xf32>
    %cst_33 = arith.constant 0.000000e+00 : f32
    %183 = vector.broadcast %cst_33 : f32 to vector<8x128xf32>
    %184 = arith.subf %183, %182 : vector<8x128xf32>
    %185 = math.exp %184 : vector<8x128xf32>
    %cst_34 = arith.constant 1.000000e+00 : f32
    %186 = vector.broadcast %cst_34 : f32 to vector<8x128xf32>
    %187 = arith.addf %186, %185 : vector<8x128xf32>
    %188 = tpu.reciprocal %187 {approx = true} : vector<8x128xf32> -> vector<8x128xf32>
    %189 = vector.broadcast %21 : vector<1x128xf32> to vector<8x128xf32>
    %190 = arith.mulf %188, %189 : vector<8x128xf32>
    %191 = vector.broadcast %24 : vector<1x128xf32> to vector<8x128xf32>
    %192 = arith.addf %190, %191 : vector<8x128xf32>
    %193 = vector.extract_strided_slice %192 {offsets = [0, 0], sizes = [8, 32], strides = [1, 1]} : vector<8x128xf32> to vector<8x32xf32>
    %194 = vector.extract_strided_slice %192 {offsets = [0, 32], sizes = [8, 32], strides = [1, 1]} : vector<8x128xf32> to vector<8x32xf32>
    %195 = vector.extract_strided_slice %192 {offsets = [0, 64], sizes = [8, 32], strides = [1, 1]} : vector<8x128xf32> to vector<8x32xf32>
    %196 = vector.extract_strided_slice %192 {offsets = [0, 96], sizes = [8, 32], strides = [1, 1]} : vector<8x128xf32> to vector<8x32xf32>
    %197 = arith.mulf %194, %174 : vector<8x32xf32>
    %198 = arith.mulf %193, %195 : vector<8x32xf32>
    %199 = arith.addf %197, %198 : vector<8x32xf32>
    %200 = math.tanh %199 : vector<8x32xf32>
    %201 = arith.mulf %196, %200 : vector<8x32xf32>
    %202 = vector.extract_strided_slice %12 {offsets = [56, 0], sizes = [8, 128], strides = [1, 1]} : vector<80x128xf32> to vector<8x128xf32>
    %203 = arith.truncf %201 : vector<8x32xf32> to vector<8x32xbf16>
    %cst_35 = arith.constant dense<0.000000e+00> : vector<8x128xf32>
    %204 = tpu.matmul %203, %8, %cst_35 {dimension_numbers = #tpu.dot_dimension_numbers<[1], [0], [0], [1], [0, 0, 1, 1], [], []>} : vector<8x32xbf16>, vector<32x128xbf16>, vector<8x128xf32> -> vector<8x128xf32>
    %205 = arith.addf %202, %204 : vector<8x128xf32>
    %206 = vector.broadcast %21 : vector<1x128xf32> to vector<8x128xf32>
    %207 = arith.mulf %205, %206 : vector<8x128xf32>
    %cst_36 = arith.constant 0.000000e+00 : f32
    %208 = vector.broadcast %cst_36 : f32 to vector<8x128xf32>
    %209 = arith.subf %208, %207 : vector<8x128xf32>
    %210 = math.exp %209 : vector<8x128xf32>
    %cst_37 = arith.constant 1.000000e+00 : f32
    %211 = vector.broadcast %cst_37 : f32 to vector<8x128xf32>
    %212 = arith.addf %211, %210 : vector<8x128xf32>
    %213 = tpu.reciprocal %212 {approx = true} : vector<8x128xf32> -> vector<8x128xf32>
    %214 = vector.broadcast %21 : vector<1x128xf32> to vector<8x128xf32>
    %215 = arith.mulf %213, %214 : vector<8x128xf32>
    %216 = vector.broadcast %24 : vector<1x128xf32> to vector<8x128xf32>
    %217 = arith.addf %215, %216 : vector<8x128xf32>
    %218 = vector.extract_strided_slice %217 {offsets = [0, 0], sizes = [8, 32], strides = [1, 1]} : vector<8x128xf32> to vector<8x32xf32>
    %219 = vector.extract_strided_slice %217 {offsets = [0, 32], sizes = [8, 32], strides = [1, 1]} : vector<8x128xf32> to vector<8x32xf32>
    %220 = vector.extract_strided_slice %217 {offsets = [0, 64], sizes = [8, 32], strides = [1, 1]} : vector<8x128xf32> to vector<8x32xf32>
    %221 = vector.extract_strided_slice %217 {offsets = [0, 96], sizes = [8, 32], strides = [1, 1]} : vector<8x128xf32> to vector<8x32xf32>
    %222 = arith.mulf %219, %199 : vector<8x32xf32>
    %223 = arith.mulf %218, %220 : vector<8x32xf32>
    %224 = arith.addf %222, %223 : vector<8x32xf32>
    %225 = math.tanh %224 : vector<8x32xf32>
    %226 = arith.mulf %221, %225 : vector<8x32xf32>
    %227 = vector.extract_strided_slice %12 {offsets = [64, 0], sizes = [8, 128], strides = [1, 1]} : vector<80x128xf32> to vector<8x128xf32>
    %228 = arith.truncf %226 : vector<8x32xf32> to vector<8x32xbf16>
    %cst_38 = arith.constant dense<0.000000e+00> : vector<8x128xf32>
    %229 = tpu.matmul %228, %8, %cst_38 {dimension_numbers = #tpu.dot_dimension_numbers<[1], [0], [0], [1], [0, 0, 1, 1], [], []>} : vector<8x32xbf16>, vector<32x128xbf16>, vector<8x128xf32> -> vector<8x128xf32>
    %230 = arith.addf %227, %229 : vector<8x128xf32>
    %231 = vector.broadcast %21 : vector<1x128xf32> to vector<8x128xf32>
    %232 = arith.mulf %230, %231 : vector<8x128xf32>
    %cst_39 = arith.constant 0.000000e+00 : f32
    %233 = vector.broadcast %cst_39 : f32 to vector<8x128xf32>
    %234 = arith.subf %233, %232 : vector<8x128xf32>
    %235 = math.exp %234 : vector<8x128xf32>
    %cst_40 = arith.constant 1.000000e+00 : f32
    %236 = vector.broadcast %cst_40 : f32 to vector<8x128xf32>
    %237 = arith.addf %236, %235 : vector<8x128xf32>
    %238 = tpu.reciprocal %237 {approx = true} : vector<8x128xf32> -> vector<8x128xf32>
    %239 = vector.broadcast %21 : vector<1x128xf32> to vector<8x128xf32>
    %240 = arith.mulf %238, %239 : vector<8x128xf32>
    %241 = vector.broadcast %24 : vector<1x128xf32> to vector<8x128xf32>
    %242 = arith.addf %240, %241 : vector<8x128xf32>
    %243 = vector.extract_strided_slice %242 {offsets = [0, 0], sizes = [8, 32], strides = [1, 1]} : vector<8x128xf32> to vector<8x32xf32>
    %244 = vector.extract_strided_slice %242 {offsets = [0, 32], sizes = [8, 32], strides = [1, 1]} : vector<8x128xf32> to vector<8x32xf32>
    %245 = vector.extract_strided_slice %242 {offsets = [0, 64], sizes = [8, 32], strides = [1, 1]} : vector<8x128xf32> to vector<8x32xf32>
    %246 = vector.extract_strided_slice %242 {offsets = [0, 96], sizes = [8, 32], strides = [1, 1]} : vector<8x128xf32> to vector<8x32xf32>
    %247 = arith.mulf %244, %224 : vector<8x32xf32>
    %248 = arith.mulf %243, %245 : vector<8x32xf32>
    %249 = arith.addf %247, %248 : vector<8x32xf32>
    %250 = math.tanh %249 : vector<8x32xf32>
    %251 = arith.mulf %246, %250 : vector<8x32xf32>
    %252 = vector.extract_strided_slice %12 {offsets = [72, 0], sizes = [8, 128], strides = [1, 1]} : vector<80x128xf32> to vector<8x128xf32>
    %253 = arith.truncf %251 : vector<8x32xf32> to vector<8x32xbf16>
    %cst_41 = arith.constant dense<0.000000e+00> : vector<8x128xf32>
    %254 = tpu.matmul %253, %8, %cst_41 {dimension_numbers = #tpu.dot_dimension_numbers<[1], [0], [0], [1], [0, 0, 1, 1], [], []>} : vector<8x32xbf16>, vector<32x128xbf16>, vector<8x128xf32> -> vector<8x128xf32>
    %255 = arith.addf %252, %254 : vector<8x128xf32>
    %256 = vector.broadcast %21 : vector<1x128xf32> to vector<8x128xf32>
    %257 = arith.mulf %255, %256 : vector<8x128xf32>
    %cst_42 = arith.constant 0.000000e+00 : f32
    %258 = vector.broadcast %cst_42 : f32 to vector<8x128xf32>
    %259 = arith.subf %258, %257 : vector<8x128xf32>
    %260 = math.exp %259 : vector<8x128xf32>
    %cst_43 = arith.constant 1.000000e+00 : f32
    %261 = vector.broadcast %cst_43 : f32 to vector<8x128xf32>
    %262 = arith.addf %261, %260 : vector<8x128xf32>
    %263 = tpu.reciprocal %262 {approx = true} : vector<8x128xf32> -> vector<8x128xf32>
    %264 = vector.broadcast %21 : vector<1x128xf32> to vector<8x128xf32>
    %265 = arith.mulf %263, %264 : vector<8x128xf32>
    %266 = vector.broadcast %24 : vector<1x128xf32> to vector<8x128xf32>
    %267 = arith.addf %265, %266 : vector<8x128xf32>
    %268 = vector.extract_strided_slice %267 {offsets = [0, 0], sizes = [8, 32], strides = [1, 1]} : vector<8x128xf32> to vector<8x32xf32>
    %269 = vector.extract_strided_slice %267 {offsets = [0, 32], sizes = [8, 32], strides = [1, 1]} : vector<8x128xf32> to vector<8x32xf32>
    %270 = vector.extract_strided_slice %267 {offsets = [0, 64], sizes = [8, 32], strides = [1, 1]} : vector<8x128xf32> to vector<8x32xf32>
    %271 = vector.extract_strided_slice %267 {offsets = [0, 96], sizes = [8, 32], strides = [1, 1]} : vector<8x128xf32> to vector<8x32xf32>
    %272 = arith.mulf %269, %249 : vector<8x32xf32>
    %273 = arith.mulf %268, %270 : vector<8x32xf32>
    %274 = arith.addf %272, %273 : vector<8x32xf32>
    %275 = math.tanh %274 : vector<8x32xf32>
    %276 = arith.mulf %271, %275 : vector<8x32xf32>
    %c0_44 = arith.constant 0 : index
    %c0_45 = arith.constant 0 : index
    %277 = vector.load %arg3[%c0_44, %c0_45] : memref<193x32xf32, #tpu.memory_space<vmem>>, vector<32x32xf32>
    %278 = arith.truncf %277 : vector<32x32xf32> to vector<32x32xbf16>
    %c160 = arith.constant 160 : index
    %c0_46 = arith.constant 0 : index
    %279 = vector.load %arg3[%c160, %c0_46] : memref<193x32xf32, #tpu.memory_space<vmem>>, vector<1x32xf32>
    %280 = arith.truncf %276 : vector<8x32xf32> to vector<8x32xbf16>
    %cst_47 = arith.constant dense<0.000000e+00> : vector<8x32xf32>
    %281 = tpu.matmul %280, %278, %cst_47 {dimension_numbers = #tpu.dot_dimension_numbers<[1], [0], [0], [1], [0, 0, 1, 1], [], []>} : vector<8x32xbf16>, vector<32x32xbf16>, vector<8x32xf32> -> vector<8x32xf32>
    %282 = vector.broadcast %279 : vector<1x32xf32> to vector<8x32xf32>
    %283 = arith.addf %281, %282 : vector<8x32xf32>
    %cst_48 = arith.constant 0.000000e+00 : f32
    %284 = vector.broadcast %cst_48 : f32 to vector<8x32xf32>
    %285 = arith.maximumf %283, %284 : vector<8x32xf32>
    %c32 = arith.constant 32 : index
    %c0_49 = arith.constant 0 : index
    %286 = vector.load %arg3[%c32, %c0_49] : memref<193x32xf32, #tpu.memory_space<vmem>>, vector<32x32xf32>
    %287 = arith.truncf %286 : vector<32x32xf32> to vector<32x32xbf16>
    %c168 = arith.constant 168 : index
    %c0_50 = arith.constant 0 : index
    %288 = vector.load %arg3[%c168, %c0_50] : memref<193x32xf32, #tpu.memory_space<vmem>>, vector<1x32xf32>
    %289 = arith.truncf %285 : vector<8x32xf32> to vector<8x32xbf16>
    %cst_51 = arith.constant dense<0.000000e+00> : vector<8x32xf32>
    %290 = tpu.matmul %289, %287, %cst_51 {dimension_numbers = #tpu.dot_dimension_numbers<[1], [0], [0], [1], [0, 0, 1, 1], [], []>} : vector<8x32xbf16>, vector<32x32xbf16>, vector<8x32xf32> -> vector<8x32xf32>
    %291 = vector.broadcast %288 : vector<1x32xf32> to vector<8x32xf32>
    %292 = arith.addf %290, %291 : vector<8x32xf32>
    %cst_52 = arith.constant 0.000000e+00 : f32
    %293 = vector.broadcast %cst_52 : f32 to vector<8x32xf32>
    %294 = arith.maximumf %292, %293 : vector<8x32xf32>
    %c64 = arith.constant 64 : index
    %c0_53 = arith.constant 0 : index
    %295 = vector.load %arg3[%c64, %c0_53] : memref<193x32xf32, #tpu.memory_space<vmem>>, vector<32x32xf32>
    %296 = arith.truncf %295 : vector<32x32xf32> to vector<32x32xbf16>
    %c176 = arith.constant 176 : index
    %c0_54 = arith.constant 0 : index
    %297 = vector.load %arg3[%c176, %c0_54] : memref<193x32xf32, #tpu.memory_space<vmem>>, vector<1x32xf32>
    %298 = arith.truncf %294 : vector<8x32xf32> to vector<8x32xbf16>
    %cst_55 = arith.constant dense<0.000000e+00> : vector<8x32xf32>
    %299 = tpu.matmul %298, %296, %cst_55 {dimension_numbers = #tpu.dot_dimension_numbers<[1], [0], [0], [1], [0, 0, 1, 1], [], []>} : vector<8x32xbf16>, vector<32x32xbf16>, vector<8x32xf32> -> vector<8x32xf32>
    %300 = vector.broadcast %297 : vector<1x32xf32> to vector<8x32xf32>
    %301 = arith.addf %299, %300 : vector<8x32xf32>
    %cst_56 = arith.constant 0.000000e+00 : f32
    %302 = vector.broadcast %cst_56 : f32 to vector<8x32xf32>
    %303 = arith.maximumf %301, %302 : vector<8x32xf32>
    %c96 = arith.constant 96 : index
    %c0_57 = arith.constant 0 : index
    %304 = vector.load %arg3[%c96, %c0_57] : memref<193x32xf32, #tpu.memory_space<vmem>>, vector<32x32xf32>
    %305 = arith.truncf %304 : vector<32x32xf32> to vector<32x32xbf16>
    %c184 = arith.constant 184 : index
    %c0_58 = arith.constant 0 : index
    %306 = vector.load %arg3[%c184, %c0_58] : memref<193x32xf32, #tpu.memory_space<vmem>>, vector<1x32xf32>
    %307 = arith.truncf %303 : vector<8x32xf32> to vector<8x32xbf16>
    %cst_59 = arith.constant dense<0.000000e+00> : vector<8x32xf32>
    %308 = tpu.matmul %307, %305, %cst_59 {dimension_numbers = #tpu.dot_dimension_numbers<[1], [0], [0], [1], [0, 0, 1, 1], [], []>} : vector<8x32xbf16>, vector<32x32xbf16>, vector<8x32xf32> -> vector<8x32xf32>
    %309 = vector.broadcast %306 : vector<1x32xf32> to vector<8x32xf32>
    %310 = arith.addf %308, %309 : vector<8x32xf32>
    %cst_60 = arith.constant 0.000000e+00 : f32
    %311 = vector.broadcast %cst_60 : f32 to vector<8x32xf32>
    %312 = arith.maximumf %310, %311 : vector<8x32xf32>
    %c128 = arith.constant 128 : index
    %c0_61 = arith.constant 0 : index
    %313 = vector.load %arg3[%c128, %c0_61] : memref<193x32xf32, #tpu.memory_space<vmem>>, vector<32x32xf32>
    %314 = arith.truncf %313 : vector<32x32xf32> to vector<32x32xbf16>
    %c192 = arith.constant 192 : index
    %c0_62 = arith.constant 0 : index
    %315 = vector.load %arg3[%c192, %c0_62] : memref<193x32xf32, #tpu.memory_space<vmem>>, vector<1x32xf32>
    %316 = arith.truncf %312 : vector<8x32xf32> to vector<8x32xbf16>
    %cst_63 = arith.constant dense<0.000000e+00> : vector<8x32xf32>
    %317 = tpu.matmul %316, %314, %cst_63 {dimension_numbers = #tpu.dot_dimension_numbers<[1], [0], [0], [1], [0, 0, 1, 1], [], []>} : vector<8x32xbf16>, vector<32x32xbf16>, vector<8x32xf32> -> vector<8x32xf32>
    %318 = vector.broadcast %315 : vector<1x32xf32> to vector<8x32xf32>
    %319 = arith.addf %317, %318 : vector<8x32xf32>
    %320 = vector.extract_strided_slice %319 {offsets = [0, 0], sizes = [8, 10], strides = [1, 1]} : vector<8x32xf32> to vector<8x10xf32>
    %cst_64 = arith.constant dense<0xFF800000> : vector<8xf32>
    %321 = vector.multi_reduction <maximumf>, %320, %cst_64 [1] : vector<8x10xf32> to vector<8xf32>
    %322 = vector.shape_cast %321 : vector<8xf32> to vector<8x1xf32>
    %323 = vector.broadcast %322 : vector<8x1xf32> to vector<8x10xf32>
    %324 = arith.subf %320, %323 : vector<8x10xf32>
    %325 = math.exp %324 : vector<8x10xf32>
    %cst_65 = arith.constant dense<0.000000e+00> : vector<8xf32>
    %326 = vector.multi_reduction <add>, %325, %cst_65 [1] : vector<8x10xf32> to vector<8xf32>
    %327 = vector.shape_cast %326 : vector<8xf32> to vector<8x1xf32>
    %328 = math.log %327 : vector<8x1xf32>
    %329 = arith.addf %328, %322 : vector<8x1xf32>
    %330 = vector.broadcast %329 : vector<8x1xf32> to vector<8x10xf32>
    %331 = arith.subf %320, %330 : vector<8x10xf32>
    %c0_66 = arith.constant 0 : index
    %c0_67 = arith.constant 0 : index
    %332 = vector.load %arg4[%c0_66, %c0_67] : memref<8x10xf32, #tpu.memory_space<vmem>>, vector<8x10xf32>
    tpu.vector_store %arg4[%c0_66, %c0_67], %331 {strides = array<i32>} : memref<8x10xf32, #tpu.memory_space<vmem>>, vector<8x10xf32>,
    return
  }
}

</mosaic_0001>

<bundles_post_ra>
// kernel: _lambda_.1
= control target key start
LH: loop header
LB: loop body
LE: loop exit
PB: predicated region body
PF: predicated region fallthrough
CT: control target
= control target key end

     0   :  { %s1275_s0 = inlined_call_operand.vmem [shape: bf16[80,80], index: 0, kind: input, shape index: {}]   ;;  %s1276_s1 = inlined_call_operand.vmem [shape: f32[80,6], index: 1, kind: input, shape index: {}]   ;;  %s1277_s2 = inlined_call_operand.vmem [shape: f32[41,128], index: 2, kind: input, shape index: {}]   ;;  %s1278_s3 = inlined_call_operand.vmem [shape: f32[193,32], index: 3, kind: input, shape index: {}]   ;;  %s1279_s4 = inlined_call_operand.hbm [shape: f32[8,10], index: 4, kind: output, shape index: {}]  }
   0x1   :  { %v37_v0 = vld [vmem:[%s1276_s1 + $0x40] sm:$0xff]  ;;  %v38_v1 = vld [vmem:[%s1276_s1 + $0x48] sm:$0xff]  ;;  %v35_v2 = vld [vmem:[%s1276_s1 + $0x30] sm:$0xff] }
   0x2   :  { %v43_v3 = vpack.c.bf16 %v38_v1, %v37_v0  ;;  %v36_v4 = vld [vmem:[%s1276_s1 + $0x38] sm:$0xff]  ;;  %v33_v6 = vld [vmem:[%s1276_s1 + $0x20] sm:$0xff]  ;;  %v34_v7 = vld [vmem:[%s1276_s1 + $0x28] sm:$0xff] }
   0x3   :  { %v42_v5 = vpack.c.bf16 %v36_v4, %v35_v2  ;;  %v128_v8 = vld [vmem:[%s1277_s2 + $0x18] sm:$0xff]  ;;  %v129_v9 = vld [vmem:[%s1277_s2 + $0x20] sm:$0xff]  ;;  %v126_v10 = vld [vmem:[%s1277_s2 + $0x8] sm:$0xff]  ;;  %v41_v13 = vpack.c.bf16 %v34_v7, %v33_v6 }
   0x4   :  { %88 = vmatpush.bf16.msra.mxu0 %v43_v3  ;;  %v127_v11 = vld [vmem:[%s1277_s2 + $0x10] sm:$0xff]  ;;  %v1027_v12 = vpack.c.bf16 %v129_v9, %v128_v8 }
   0x5   :  { %v1030_v14 = vpack.c.bf16 %v127_v11, %v126_v10 }
   0x6   :  { %205 = vmatpush.bf16.msra.mxu2 %v1027_v12 }
   0x8   :  { %89 = vmatpush.bf16.msra.mxu0 %v42_v5 }
   0x9   :  { %9 = vsyncpa [#allocation3], 0  ;;  %v31_v15 = vld [vmem:[%s1276_s1 + $0x10] sm:$0xff]  ;;  %v32_v16 = vld [vmem:[%s1276_s1 + $0x18] sm:$0xff]  ;;  %251 = vmatpush.bf16.msra.mxu3 %v1027_v12  ;;  %v966_v20 = vmov 0   ;;  %vm69_vm0 = vcmask 654336   ;;  %v188_v31 = vlaneseq }
   0xa   :  { %v40_v17 = vpack.c.bf16 %v32_v16, %v31_v15  ;;  %206 = vmatpush.bf16.msra.mxu2 %v1030_v14  ;;  %v29_v18 = vld [vmem:[%s1276_s1] sm:$0xff]  ;;  %v30_v19 = vld [vmem:[%s1276_s1 + $0x8] sm:$0xff]  ;;  %vm150_vm1 = vcmask 1042432   ;;  %vm134_vm2 = vcmask 48128   ;;  %v967_v36 = vmov 1.0   ;;  %s970_s22 = smov 32  }
   0xb   :  { %v39_v21 = vpack.c.bf16 %v30_v19, %v29_v18  ;;  %v859_v22 = vld [vmem:[%s1275_s0] sm:$0xff]  ;;  %v189_v32 = vand.u32 127, %v188_v31  ;;  %v1064_v33 = vld [vmem:[%s1277_s2 + $0x28] ss:$0 sm:$0xff]  ;;  %v968_v45 = vmov 0.0   ;;  %vm195_vm6 = vcmask 261120  }
   0xc   :  { %90 = vmatpush.bf16.msra.mxu0 %v41_v13  ;;  %v124_v23 = vld [vmem:[%s1277_s2] sm:$0x3f]  ;;  %s969_s2 = smov 64   ;;  %v860_v10 = vld [vmem:[%s1275_s0 + $0x8] sm:$0xff]  ;;  %vm784_vm7 = vcmask 80896   ;;  %s806_s26 = sshll.u32 %s1279_s4, 4  ;;  %s807_s26 = int_to_ptr.hbm [resolvable:$true] %s806_s26 }
   0xd   :  { %252 = vmatpush.bf16.msra.mxu3 %v1030_v14  ;;  %207 = vmatmul.bf16.vlgmr.msra.gmra.mxu2 %v966_v20  ;;  %v125_v24 = vpack.c.bf16 %v124_v23, %v124_v23  ;;  %vm190_vm3 = vcmp.ge.s32.totalorder %v189_v32, 64  ;;  %vm191_vm4 = vcmp.lt.s32.totalorder %v189_v32, 96 }
   0xe   :  { %297 = vmatpush.bf16.msrb.mxu2 %v1027_v12  ;;  %vm192_vm5 = vmand %vm190_vm3, %vm191_vm4 }
   0xf   :  { %v152_v25 = vsel %vm150_vm1, %v125_v24, 0  ;;  %v1067_v37 = vsel %vm192_vm5, 2.0, %v967_v36  ;;  %v1070_v46 = vsel %vm192_vm5, -1.0, %v968_v45 }
  0x10   :  { %91 = vmatpush.bf16.msra.mxu0 %v40_v17  ;;  %161 = vmatpush.bf16.msra.mxu1 %v152_v25 }
  0x11   :  { %343 = vmatpush.bf16.msrb.mxu3 %v1027_v12 }
  0x12   :  { %298 = vmatpush.bf16.msrb.mxu2 %v1030_v14 }
  0x14   :  { %92 = vmatpush.bf16.msra.mxu0 %v39_v21 }
  0x15   :  { %344 = vmatpush.bf16.msrb.mxu3 %v1030_v14 }
  0x16   :  { %389 = vmatpush.bf16.msra.mxu2 %v1027_v12 }
  0x17   :  { %835 = vmatmul.msk.bf16.vlgmr.msra.gmra.mxu0 %vm69_vm0, %v859_v22 }
  0x1a   :  { %390 = vmatpush.bf16.msra.mxu2 %v1030_v14 }
  0x27   :  { %836 = vmatmul.msk.bf16.gmra.mxu0 %vm69_vm0, %v860_v10 }
  0x90   :  { %v208_v26 = vpop.f32.mrf.mxu2 }
  0x94   :  { %v94_v27 = vpop.f32.mrf.mxu0 }
  0x98   :  { %v210_v28 = vpop.f32.mrf.mxu2 }
  0x9c   :  { %v96_v29 = vpop.f32.mrf.mxu0 }
  0x9d   :  { %v119_v30 = vpack.c.bf16 %v96_v29, %v94_v27 }
  0x9f   :  { %840 = vmatmul.msk.bf16.vlgmr.msra.gmra.mxu1 %vm134_vm2, %v119_v30 }
  0xa4   :  { %v99_v17 = vpop.f32.mrf.mxu0 }
  0xac   :  { %v101_v18 = vpop.f32.mrf.mxu0 }
  0xad   :  { %v120_v19 = vpack.c.bf16 %v101_v18, %v99_v17 }
  0xaf   :  { %841 = vmatmul.msk.bf16.gmra.mxu1 %vm134_vm2, %v120_v19 }
 0x11c   :  { %v163_v34 = vpop.f32.mrf.mxu1 }
 0x11d   :  { %v164_v35 = vadd.f32 %v1064_v33, %v163_v34 }
 0x11f   :  { %v212_v38 = vadd.f32 %v208_v26, %v164_v35 }
 0x121   :  { %v213_v39 = vmul.f32 %v212_v38, %v1067_v37 }
 0x123   :  { %v214_v40 = vsub.f32 0.0, %v213_v39 }
 0x124   :  { %v165_v59 = vpop.f32.mrf.mxu1 }
 0x125   :  { %v215_v41 = vmul.f32 1.442695, %v214_v40  ;;  %v166_v60 = vadd.f32 %v1064_v33, %v165_v59 }
 0x127   :  { %876 = vpow2.f32 %v215_v41 }
 0x12c   :  { %v168_v24 = vpop.f32.mrf.mxu1 }
 0x12d   :  { %v877_v42 = vpop.eup %876  ;;  %v169_v25 = vadd.f32 %v1064_v33, %v168_v24 }
 0x12e   :  { %v217_v43 = vadd.f32 1.0, %v877_v42 }
 0x130   :  { %878 = vrcp.f32 %v217_v43 }
 0x136   :  { %v879_v44 = vpop.eup %878 }
 0x137   :  { %v219_v47 = vmul.f32 %v879_v44, %v1067_v37 }
 0x139   :  { %v220_v48 = vadd.f32 %v219_v47, %v1070_v46 }
 0x13b   :  { %223 = vrot.lane.b32.xlu0 %v220_v48, %s969_s2  ;;  %v221_v51 = vmul.f32 0.0, %v220_v48 }
 0x1ad   :  { %v224_v49 = vpop.permute.xlu0 %223 }
 0x1ae   :  { %v226_v50 = vmul.f32 %v224_v49, %v220_v48 }
 0x1b0   :  { %228 = vrot.lane.b32.xlu0 %v226_v50, %s970_s22  ;;  %v170_v50 = vpop.f32.mrf.mxu1 }
 0x222   :  { %v229_v52 = vpop.permute.xlu0 %228 }
 0x223   :  { %v231_v53 = vadd.f32 %v229_v52, %v221_v51  ;;  %v171_v51 = vadd.f32 %v1064_v33, %v170_v50 }
 0x225   :  { %880 = vtanh.f32 %v231_v53 }
 0x22b   :  { %v881_v54 = vpop.eup %880 }
 0x22c   :  { %234 = vrot.lane.b32.xlu1 %v881_v54, %s969_s2 }
 0x29e   :  { %v235_v55 = vpop.permute.xlu1 %234 }
 0x29f   :  { %v237_v56 = vmul.f32 %v235_v55, %v220_v48 }
 0x2a1   :  { %v238_v57 = vpack.c.bf16 %v237_v56, %v237_v56 }
 0x2a3   :  { %240 = vrot.lane.b32.xlu1 %v238_v57, %s970_s22 }
 0x315   :  { %v241_v58 = vpop.permute.xlu1 %240 }
 0x316   :  { %845 = vmatmul.msk.bf16.vlgmr.msra.gmra.mxu3 %vm195_vm6, %v241_v58 }
 0x317   :  { %435 = vmatpush.bf16.msra.mxu3 %v1027_v12 }
 0x31b   :  { %436 = vmatpush.bf16.msra.mxu3 %v1030_v14 }
 0x399   :  { %v254_v61 = vpop.f32.mrf.mxu3 }
 0x39a   :  { %v258_v62 = vadd.f32 %v254_v61, %v166_v60 }
 0x39c   :  { %v259_v63 = vmul.f32 %v258_v62, %v1067_v37 }
 0x39e   :  { %v260_v0 = vsub.f32 0.0, %v259_v63 }
 0x3a0   :  { %v261_v1 = vmul.f32 1.442695, %v260_v0 }
 0x3a1   :  { %v256_v2 = vpop.f32.mrf.mxu3 }
 0x3a2   :  { %882 = vpow2.f32 %v261_v1  ;;  %v861_v1 = vld [vmem:[%s1275_s0 + $0x10] sm:$0xff] }
 0x3a3   :  { %837 = vmatmul.msk.bf16.gmra.mxu0 %vm69_vm0, %v861_v1 }
 0x3a8   :  { %v883_v3 = vpop.eup %882 }
 0x3a9   :  { %v263_v4 = vadd.f32 1.0, %v883_v3 }
 0x3ab   :  { %884 = vrcp.f32 %v263_v4 }
 0x3b1   :  { %v885_v5 = vpop.eup %884 }
 0x3b2   :  { %v265_v6 = vmul.f32 %v885_v5, %v1067_v37 }
 0x3b4   :  { %v266_v7 = vadd.f32 %v265_v6, %v1070_v46 }
 0x3b6   :  { %269 = vrot.lane.b32.xlu2 %v266_v7, %s969_s2  ;;  %v267_v11 = vmul.f32 %v266_v7, %v231_v53 }
 0x410   :  { %v270_v8 = vpop.permute.xlu2 %269 }
 0x411   :  { %v272_v9 = vmul.f32 %v270_v8, %v266_v7 }
 0x413   :  { %274 = vrot.lane.b32.xlu2 %v272_v9, %s970_s22 }
 0x420   :  { %v104_v9 = vpop.f32.mrf.mxu0 }
 0x428   :  { %v106_v10 = vpop.f32.mrf.mxu0 }
 0x46d   :  { %v275_v13 = vpop.permute.xlu2 %274 }
 0x46e   :  { %v277_v15 = vadd.f32 %v275_v13, %v267_v11  ;;  %v121_v11 = vpack.c.bf16 %v106_v10, %v104_v9 }
 0x470   :  { %886 = vtanh.f32 %v277_v15  ;;  %842 = vmatmul.msk.bf16.gmra.mxu1 %vm134_vm2, %v121_v11 }
 0x476   :  { %v887_v16 = vpop.eup %886 }
 0x477   :  { %280 = vrot.lane.b32.xlu0 %v887_v16, %s969_s2 }
 0x4e9   :  { %v281_v20 = vpop.permute.xlu0 %280 }
 0x4ea   :  { %v283_v21 = vmul.f32 %v281_v20, %v266_v7 }
 0x4ec   :  { %v284_v22 = vpack.c.bf16 %v283_v21, %v283_v21 }
 0x4ee   :  { %286 = vrot.lane.b32.xlu1 %v284_v22, %s970_s22 }
 0x560   :  { %v287_v23 = vpop.permute.xlu1 %286 }
 0x561   :  { %846 = vmatmul.msk.bf16.vlgmr.msrb.gmra.mxu2 %vm195_vm6, %v287_v23 }
 0x562   :  { %481 = vmatpush.bf16.msrb.mxu2 %v1027_v12 }
 0x566   :  { %482 = vmatpush.bf16.msrb.mxu2 %v1030_v14 }
 0x5e4   :  { %v300_v26 = vpop.f32.mrf.mxu2 }
 0x5e5   :  { %v304_v27 = vadd.f32 %v300_v26, %v169_v25 }
 0x5e7   :  { %v305_v28 = vmul.f32 %v304_v27, %v1067_v37 }
 0x5e9   :  { %v306_v29 = vsub.f32 0.0, %v305_v28 }
 0x5eb   :  { %v307_v30 = vmul.f32 1.442695, %v306_v29 }
 0x5ec   :  { %v302_v31 = vpop.f32.mrf.mxu2 }
 0x5ed   :  { %888 = vpow2.f32 %v307_v30 }
 0x5f3   :  { %v889_v32 = vpop.eup %888 }
 0x5f4   :  { %v309_v34 = vadd.f32 1.0, %v889_v32 }
 0x5f6   :  { %890 = vrcp.f32 %v309_v34 }
 0x5fc   :  { %v891_v35 = vpop.eup %890 }
 0x5fd   :  { %v311_v36 = vmul.f32 %v891_v35, %v1067_v37 }
 0x5ff   :  { %v312_v38 = vadd.f32 %v311_v36, %v1070_v46 }
 0x601   :  { %315 = vrot.lane.b32.xlu2 %v312_v38, %s969_s2  ;;  %v313_v41 = vmul.f32 %v312_v38, %v277_v15  ;;  %v173_v15 = vpop.f32.mrf.mxu1 }
 0x602   :  { %v174_v16 = vadd.f32 %v1064_v33, %v173_v15 }
 0x65b   :  { %v316_v39 = vpop.permute.xlu2 %315 }
 0x65c   :  { %v318_v40 = vmul.f32 %v316_v39, %v312_v38 }
 0x65e   :  { %320 = vrot.lane.b32.xlu0 %v318_v40, %s970_s22  ;;  %v175_v40 = vpop.f32.mrf.mxu1 }
 0x6d0   :  { %v321_v42 = vpop.permute.xlu0 %320 }
 0x6d1   :  { %v323_v43 = vadd.f32 %v321_v42, %v313_v41  ;;  %v176_v41 = vadd.f32 %v1064_v33, %v175_v40 }
 0x6d3   :  { %892 = vtanh.f32 %v323_v43 }
 0x6d9   :  { %v893_v44 = vpop.eup %892 }
 0x6da   :  { %326 = vrot.lane.b32.xlu1 %v893_v44, %s969_s2 }
 0x74c   :  { %v327_v45 = vpop.permute.xlu1 %326 }
 0x74d   :  { %v329_v47 = vmul.f32 %v327_v45, %v312_v38 }
 0x74f   :  { %v330_v48 = vpack.c.bf16 %v329_v47, %v329_v47 }
 0x751   :  { %332 = vrot.lane.b32.xlu2 %v330_v48, %s970_s22 }
 0x7ab   :  { %v333_v49 = vpop.permute.xlu2 %332 }
 0x7ac   :  { %847 = vmatmul.msk.bf16.vlgmr.msrb.gmra.mxu3 %vm195_vm6, %v333_v49 }
 0x7ad   :  { %527 = vmatpush.bf16.msrb.mxu3 %v1027_v12 }
 0x7b1   :  { %528 = vmatpush.bf16.msrb.mxu3 %v1030_v14 }
 0x82f   :  { %v346_v52 = vpop.f32.mrf.mxu3 }
 0x830   :  { %v350_v53 = vadd.f32 %v346_v52, %v171_v51 }
 0x832   :  { %v351_v54 = vmul.f32 %v350_v53, %v1067_v37 }
 0x834   :  { %v352_v55 = vsub.f32 0.0, %v351_v54  ;;  %v862_v54 = vld [vmem:[%s1275_s0 + $0x18] sm:$0xff] }
 0x835   :  { %838 = vmatmul.msk.bf16.gmra.mxu0 %vm69_vm0, %v862_v54 }
 0x836   :  { %v353_v56 = vmul.f32 1.442695, %v352_v55 }
 0x837   :  { %v348_v57 = vpop.f32.mrf.mxu3 }
 0x838   :  { %894 = vpow2.f32 %v353_v56 }
 0x83e   :  { %v895_v58 = vpop.eup %894 }
 0x83f   :  { %v355_v59 = vadd.f32 1.0, %v895_v58 }
 0x841   :  { %896 = vrcp.f32 %v355_v59 }
 0x847   :  { %v897_v60 = vpop.eup %896 }
 0x848   :  { %v357_v61 = vmul.f32 %v897_v60, %v1067_v37 }
 0x84a   :  { %v358_v62 = vadd.f32 %v357_v61, %v1070_v46 }
 0x84c   :  { %361 = vrot.lane.b32.xlu0 %v358_v62, %s969_s2  ;;  %v359_v2 = vmul.f32 %v358_v62, %v323_v43 }
 0x8b2   :  { %v109_v59 = vpop.f32.mrf.mxu0 }
 0x8ba   :  { %v111_v60 = vpop.f32.mrf.mxu0 }
 0x8bb   :  { %v122_v61 = vpack.c.bf16 %v111_v60, %v109_v59 }
 0x8bd   :  { %843 = vmatmul.msk.bf16.gmra.mxu1 %vm134_vm2, %v122_v61 }
 0x8be   :  { %v362_v63 = vpop.permute.xlu0 %361 }
 0x8bf   :  { %v364_v0 = vmul.f32 %v362_v63, %v358_v62 }
 0x8c1   :  { %366 = vrot.lane.b32.xlu1 %v364_v0, %s970_s22 }
 0x933   :  { %v367_v3 = vpop.permute.xlu1 %366 }
 0x934   :  { %v369_v4 = vadd.f32 %v367_v3, %v359_v2 }
 0x936   :  { %898 = vtanh.f32 %v369_v4 }
 0x93a   :  { %v178_v2 = vpop.f32.mrf.mxu1 }
 0x93b   :  { %v179_v3 = vadd.f32 %v1064_v33, %v178_v2 }
 0x93c   :  { %v899_v5 = vpop.eup %898 }
 0x93d   :  { %372 = vrot.lane.b32.xlu2 %v899_v5, %s969_s2 }
 0x997   :  { %v373_v6 = vpop.permute.xlu2 %372 }
 0x998   :  { %v375_v7 = vmul.f32 %v373_v6, %v358_v62 }
 0x99a   :  { %v376_v8 = vpack.c.bf16 %v375_v7, %v375_v7 }
 0x99c   :  { %378 = vrot.lane.b32.xlu0 %v376_v8, %s970_s22 }
 0xa0e   :  { %v379_v13 = vpop.permute.xlu0 %378 }
 0xa0f   :  { %848 = vmatmul.msk.bf16.vlgmr.msra.gmra.mxu2 %vm195_vm6, %v379_v13 }
 0xa10   :  { %573 = vmatpush.bf16.msra.mxu2 %v1027_v12 }
 0xa14   :  { %574 = vmatpush.bf16.msra.mxu2 %v1030_v14 }
 0xa92   :  { %v392_v17 = vpop.f32.mrf.mxu2 }
 0xa93   :  { %v396_v18 = vadd.f32 %v392_v17, %v174_v16 }
 0xa95   :  { %v397_v19 = vmul.f32 %v396_v18, %v1067_v37 }
 0xa97   :  { %v398_v20 = vsub.f32 0.0, %v397_v19 }
 0xa99   :  { %v399_v21 = vmul.f32 1.442695, %v398_v20 }
 0xa9a   :  { %v394_v22 = vpop.f32.mrf.mxu2 }
 0xa9b   :  { %900 = vpow2.f32 %v399_v21 }
 0xaa1   :  { %v901_v23 = vpop.eup %900 }
 0xaa2   :  { %v401_v24 = vadd.f32 1.0, %v901_v23 }
 0xaa4   :  { %902 = vrcp.f32 %v401_v24 }
 0xaaa   :  { %v903_v25 = vpop.eup %902 }
 0xaab   :  { %v403_v26 = vmul.f32 %v903_v25, %v1067_v37 }
 0xaad   :  { %v404_v27 = vadd.f32 %v403_v26, %v1070_v46 }
 0xaaf   :  { %407 = vrot.lane.b32.xlu1 %v404_v27, %s969_s2  ;;  %v405_v30 = vmul.f32 %v404_v27, %v369_v4 }
 0xb21   :  { %v408_v28 = vpop.permute.xlu1 %407 }
 0xb22   :  { %v410_v29 = vmul.f32 %v408_v28, %v404_v27 }
 0xb24   :  { %412 = vrot.lane.b32.xlu2 %v410_v29, %s970_s22 }
 0xb7e   :  { %v413_v31 = vpop.permute.xlu2 %412 }
 0xb7f   :  { %v415_v32 = vadd.f32 %v413_v31, %v405_v30 }
 0xb81   :  { %904 = vtanh.f32 %v415_v32 }
 0xb87   :  { %v905_v34 = vpop.eup %904 }
 0xb88   :  { %418 = vrot.lane.b32.xlu0 %v905_v34, %s969_s2 }
 0xbfa   :  { %v419_v35 = vpop.permute.xlu0 %418 }
 0xbfb   :  { %v421_v36 = vmul.f32 %v419_v35, %v404_v27  ;;  %v180_v27 = vpop.f32.mrf.mxu1 }
 0xbfc   :  { %v181_v28 = vadd.f32 %v1064_v33, %v180_v27 }
 0xbfd   :  { %v422_v38 = vpack.c.bf16 %v421_v36, %v421_v36 }
 0xbff   :  { %424 = vrot.lane.b32.xlu1 %v422_v38, %s970_s22 }
 0xc71   :  { %v425_v39 = vpop.permute.xlu1 %424 }
 0xc72   :  { %849 = vmatmul.msk.bf16.vlgmr.msra.gmra.mxu3 %vm195_vm6, %v425_v39 }
 0xc73   :  { %619 = vmatpush.bf16.msra.mxu3 %v1027_v12 }
 0xc77   :  { %620 = vmatpush.bf16.msra.mxu3 %v1030_v14 }
 0xcf5   :  { %v438_v42 = vpop.f32.mrf.mxu3 }
 0xcf6   :  { %v442_v43 = vadd.f32 %v438_v42, %v176_v41 }
 0xcf8   :  { %v443_v44 = vmul.f32 %v442_v43, %v1067_v37 }
 0xcfa   :  { %v444_v45 = vsub.f32 0.0, %v443_v44  ;;  %v863_v44 = vld [vmem:[%s1275_s0 + $0x20] sm:$0xff] }
 0xcfb   :  { %839 = vmatmul.msk.bf16.gmra.mxu0 %vm69_vm0, %v863_v44  ;;  %v684_v44 = vld [vmem:[%s1278_s3 + $0x38] sm:$0xff] }
 0xcfc   :  { %v445_v47 = vmul.f32 1.442695, %v444_v45 }
 0xcfd   :  { %v440_v48 = vpop.f32.mrf.mxu3 }
 0xcfe   :  { %906 = vpow2.f32 %v445_v47 }
 0xd04   :  { %v907_v49 = vpop.eup %906 }
 0xd05   :  { %v447_v50 = vadd.f32 1.0, %v907_v49 }
 0xd07   :  { %908 = vrcp.f32 %v447_v50 }
 0xd0d   :  { %v909_v51 = vpop.eup %908 }
 0xd0e   :  { %v449_v52 = vmul.f32 %v909_v51, %v1067_v37 }
 0xd10   :  { %v450_v12 = vadd.f32 %v449_v52, %v1070_v46 }
 0xd12   :  { %453 = vrot.lane.b32.xlu2 %v450_v12, %s969_s2  ;;  %v451_v55 = vmul.f32 %v450_v12, %v415_v32 }
 0xd6c   :  { %v454_v14 = vpop.permute.xlu2 %453 }
 0xd6d   :  { %v456_v53 = vmul.f32 %v454_v14, %v450_v12 }
 0xd6f   :  { %458 = vrot.lane.b32.xlu0 %v456_v53, %s970_s22 }
 0xd78   :  { %v114_v50 = vpop.f32.mrf.mxu0 }
 0xd80   :  { %v116_v51 = vpop.f32.mrf.mxu0 }
 0xd81   :  { %v123_v52 = vpack.c.bf16 %v116_v51, %v114_v50  ;;  %v709_v51 = vld [vmem:[%s1278_s3 + $0x50] sm:$0xff] }
 0xd83   :  { %844 = vmatmul.msk.bf16.gmra.mxu1 %vm134_vm2, %v123_v52  ;;  %v710_v52 = vld [vmem:[%s1278_s3 + $0x58] sm:$0xff] }
 0xde1   :  { %v459_v56 = vpop.permute.xlu0 %458 }
 0xde2   :  { %v461_v57 = vadd.f32 %v459_v56, %v451_v55 }
 0xde4   :  { %910 = vtanh.f32 %v461_v57 }
 0xdea   :  { %v911_v58 = vpop.eup %910 }
 0xdeb   :  { %464 = vrot.lane.b32.xlu1 %v911_v58, %s969_s2 }
 0xe00   :  { %v183_v55 = vpop.f32.mrf.mxu1 }
 0xe01   :  { %v184_v56 = vadd.f32 %v1064_v33, %v183_v55  ;;  %v871_v55 = vld [vmem:[%s1278_s3 + $0xa0] ss:$0 sm:$0xff] }
 0xe5d   :  { %v465_v62 = vpop.permute.xlu1 %464 }
 0xe5e   :  { %v467_v63 = vmul.f32 %v465_v62, %v450_v12 }
 0xe60   :  { %v468_v0 = vpack.c.bf16 %v467_v63, %v467_v63 }
 0xe62   :  { %470 = vrot.lane.b32.xlu2 %v468_v0, %s970_s22 }
 0xebc   :  { %v471_v1 = vpop.permute.xlu2 %470 }
 0xebd   :  { %850 = vmatmul.msk.bf16.vlgmr.msrb.gmra.mxu2 %vm195_vm6, %v471_v1 }
 0xf40   :  { %v484_v4 = vpop.f32.mrf.mxu2 }
 0xf41   :  { %v488_v5 = vadd.f32 %v484_v4, %v179_v3 }
 0xf43   :  { %v489_v6 = vmul.f32 %v488_v5, %v1067_v37 }
 0xf45   :  { %v490_v7 = vsub.f32 0.0, %v489_v6 }
 0xf47   :  { %v491_v8 = vmul.f32 1.442695, %v490_v7 }
 0xf48   :  { %v486_v9 = vpop.f32.mrf.mxu2 }
 0xf49   :  { %912 = vpow2.f32 %v491_v8 }
 0xf4f   :  { %v913_v10 = vpop.eup %912 }
 0xf50   :  { %v493_v11 = vadd.f32 1.0, %v913_v10 }
 0xf52   :  { %914 = vrcp.f32 %v493_v11 }
 0xf58   :  { %v915_v13 = vpop.eup %914 }
 0xf59   :  { %v495_v15 = vmul.f32 %v915_v13, %v1067_v37 }
 0xf5b   :  { %v496_v16 = vadd.f32 %v495_v15, %v1070_v46 }
 0xf5d   :  { %499 = vrot.lane.b32.xlu0 %v496_v16, %s969_s2  ;;  %v497_v19 = vmul.f32 %v496_v16, %v461_v57 }
 0xfcf   :  { %v500_v17 = vpop.permute.xlu0 %499 }
 0xfd0   :  { %v502_v18 = vmul.f32 %v500_v17, %v496_v16 }
 0xfd2   :  { %504 = vrot.lane.b32.xlu1 %v502_v18, %s970_s22 }
0x1044   :  { %v505_v20 = vpop.permute.xlu1 %504 }
0x1045   :  { %v507_v21 = vadd.f32 %v505_v20, %v497_v19 }
0x1047   :  { %916 = vtanh.f32 %v507_v21 }
0x104d   :  { %v917_v22 = vpop.eup %916 }
0x104e   :  { %510 = vrot.lane.b32.xlu2 %v917_v22, %s969_s2 }
0x10a8   :  { %v511_v23 = vpop.permute.xlu2 %510 }
0x10a9   :  { %v513_v24 = vmul.f32 %v511_v23, %v496_v16  ;;  %v185_v16 = vpop.f32.mrf.mxu1 }
0x10aa   :  { %v186_v17 = vadd.f32 %v1064_v33, %v185_v16 }
0x10ab   :  { %v514_v25 = vpack.c.bf16 %v513_v24, %v513_v24 }
0x10ad   :  { %516 = vrot.lane.b32.xlu0 %v514_v25, %s970_s22 }
0x111f   :  { %v517_v26 = vpop.permute.xlu0 %516 }
0x1120   :  { %851 = vmatmul.msk.bf16.vlgmr.msrb.gmra.mxu3 %vm195_vm6, %v517_v26 }
0x11a3   :  { %v530_v29 = vpop.f32.mrf.mxu3 }
0x11a4   :  { %v534_v30 = vadd.f32 %v530_v29, %v181_v28 }
0x11a6   :  { %v535_v31 = vmul.f32 %v534_v30, %v1067_v37 }
0x11a8   :  { %v536_v32 = vsub.f32 0.0, %v535_v31 }
0x11aa   :  { %v537_v34 = vmul.f32 1.442695, %v536_v32 }
0x11ab   :  { %v532_v35 = vpop.f32.mrf.mxu3 }
0x11ac   :  { %918 = vpow2.f32 %v537_v34  ;;  %v654_v35 = vld [vmem:[%s1278_s3 + $0x10] sm:$0xff] }
0x11b2   :  { %v919_v36 = vpop.eup %918 }
0x11b3   :  { %v539_v38 = vadd.f32 1.0, %v919_v36 }
0x11b5   :  { %920 = vrcp.f32 %v539_v38  ;;  %v653_v38 = vld [vmem:[%s1278_s3 + $0x8] sm:$0xff] }
0x11bb   :  { %v921_v39 = vpop.eup %920 }
0x11bc   :  { %v541_v40 = vmul.f32 %v921_v39, %v1067_v37 }
0x11be   :  { %v542_v41 = vadd.f32 %v541_v40, %v1070_v46 }
0x11c0   :  { %545 = vrot.lane.b32.xlu1 %v542_v41, %s969_s2  ;;  %v543_v45 = vmul.f32 %v542_v41, %v507_v21 }
0x1232   :  { %v546_v42 = vpop.permute.xlu1 %545 }
0x1233   :  { %v548_v43 = vmul.f32 %v546_v42, %v542_v41 }
0x1235   :  { %550 = vrot.lane.b32.xlu2 %v548_v43, %s970_s22  ;;  %v683_v43 = vld [vmem:[%s1278_s3 + $0x30] sm:$0xff] }
0x128f   :  { %v551_v47 = vpop.permute.xlu2 %550 }
0x1290   :  { %v553_v48 = vadd.f32 %v551_v47, %v543_v45  ;;  %v681_v45 = vld [vmem:[%s1278_s3 + $0x20] sm:$0xff]  ;;  %v686_v47 = vpack.c.bf16 %v684_v44, %v683_v43 }
0x1292   :  { %922 = vtanh.f32 %v553_v48  ;;  %699 = vmatpush.bf16.msrb.mxu2 %v686_v47 }
0x1298   :  { %v923_v49 = vpop.eup %922 }
0x1299   :  { %556 = vrot.lane.b32.xlu0 %v923_v49, %s969_s2 }
0x130b   :  { %v557_v12 = vpop.permute.xlu0 %556 }
0x130c   :  { %v559_v14 = vmul.f32 %v557_v12, %v542_v41  ;;  %v707_v12 = vld [vmem:[%s1278_s3 + $0x40] sm:$0xff] }
0x130e   :  { %v560_v53 = vpack.c.bf16 %v559_v14, %v559_v14  ;;  %v712_v14 = vpack.c.bf16 %v710_v52, %v709_v51 }
0x1310   :  { %562 = vrot.lane.b32.xlu1 %v560_v53, %s970_s22  ;;  %v708_v53 = vld [vmem:[%s1278_s3 + $0x48] sm:$0xff]  ;;  %725 = vmatpush.bf16.msrb.mxu3 %v712_v14 }
0x1382   :  { %v563_v54 = vpop.permute.xlu1 %562 }
0x1383   :  { %852 = vmatmul.msk.bf16.vlgmr.msra.gmra.mxu2 %vm195_vm6, %v563_v54  ;;  %v711_v54 = vpack.c.bf16 %v708_v53, %v707_v12 }
0x1385   :  { %726 = vmatpush.bf16.msrb.mxu3 %v711_v54 }
0x1406   :  { %v576_v57 = vpop.f32.mrf.mxu2 }
0x1407   :  { %v580_v58 = vadd.f32 %v576_v57, %v184_v56 }
0x1409   :  { %v581_v59 = vmul.f32 %v580_v58, %v1067_v37 }
0x140b   :  { %v582_v60 = vsub.f32 0.0, %v581_v59 }
0x140d   :  { %v583_v61 = vmul.f32 1.442695, %v582_v60 }
0x140e   :  { %v578_v62 = vpop.f32.mrf.mxu2 }
0x140f   :  { %924 = vpow2.f32 %v583_v61  ;;  %v735_v61 = vld [vmem:[%s1278_s3 + $0x70] sm:$0xff]  ;;  %v736_v62 = vld [vmem:[%s1278_s3 + $0x78] sm:$0xff] }
0x1415   :  { %v925_v63 = vpop.eup %924 }
0x1416   :  { %v585_v0 = vadd.f32 1.0, %v925_v63  ;;  %v733_v63 = vld [vmem:[%s1278_s3 + $0x60] sm:$0xff] }
0x1418   :  { %926 = vrcp.f32 %v585_v0  ;;  %v738_v0 = vpack.c.bf16 %v736_v62, %v735_v61 }
0x141a   :  { %751 = vmatpush.bf16.msrb.mxu0 %v738_v0 }
0x141e   :  { %v927_v1 = vpop.eup %926 }
0x141f   :  { %v587_v2 = vmul.f32 %v927_v1, %v1067_v37  ;;  %v734_v1 = vld [vmem:[%s1278_s3 + $0x68] sm:$0xff] }
0x1421   :  { %v588_v3 = vadd.f32 %v587_v2, %v1070_v46  ;;  %v737_v2 = vpack.c.bf16 %v734_v1, %v733_v63 }
0x1423   :  { %591 = vrot.lane.b32.xlu2 %v588_v3, %s969_s2  ;;  %v589_v6 = vmul.f32 %v588_v3, %v553_v48  ;;  %v682_v48 = vld [vmem:[%s1278_s3 + $0x28] sm:$0xff]  ;;  %752 = vmatpush.bf16.msrb.mxu0 %v737_v2 }
0x1424   :  { %v685_v49 = vpack.c.bf16 %v682_v48, %v681_v45 }
0x1426   :  { %700 = vmatpush.bf16.msrb.mxu2 %v685_v49 }
0x147d   :  { %v592_v4 = vpop.permute.xlu2 %591 }
0x147e   :  { %v594_v5 = vmul.f32 %v592_v4, %v588_v3 }
0x1480   :  { %596 = vrot.lane.b32.xlu0 %v594_v5, %s970_s22 }
0x14f2   :  { %v597_v7 = vpop.permute.xlu0 %596 }
0x14f3   :  { %v599_v8 = vadd.f32 %v597_v7, %v589_v6 }
0x14f5   :  { %928 = vtanh.f32 %v599_v8 }
0x14fb   :  { %v929_v9 = vpop.eup %928 }
0x14fc   :  { %602 = vrot.lane.b32.xlu1 %v929_v9, %s969_s2  ;;  %v761_v9 = vld [vmem:[%s1278_s3 + $0x90] sm:$0xff] }
0x156e   :  { %v603_v10 = vpop.permute.xlu1 %602 }
0x156f   :  { %v605_v11 = vmul.f32 %v603_v10, %v588_v3  ;;  %v872_v3 = vld [vmem:[%s1278_s3 + $0xa8] ss:$0 sm:$0xff]  ;;  %v762_v10 = vld [vmem:[%s1278_s3 + $0x98] sm:$0xff] }
0x1571   :  { %v606_v13 = vpack.c.bf16 %v605_v11, %v605_v11  ;;  %v759_v11 = vld [vmem:[%s1278_s3 + $0x80] sm:$0xff] }
0x1573   :  { %608 = vrot.lane.b32.xlu2 %v606_v13, %s970_s22  ;;  %v764_v13 = vpack.c.bf16 %v762_v10, %v761_v9 }
0x15cd   :  { %v609_v15 = vpop.permute.xlu2 %608 }
0x15ce   :  { %853 = vmatmul.msk.bf16.vlgmr.msra.gmra.mxu3 %vm195_vm6, %v609_v15  ;;  %v760_v15 = vld [vmem:[%s1278_s3 + $0x88] sm:$0xff] }
0x15cf   :  { %v763_v16 = vpack.c.bf16 %v760_v15, %v759_v11 }
0x1651   :  { %v622_v18 = vpop.f32.mrf.mxu3 }
0x1652   :  { %v626_v19 = vadd.f32 %v622_v18, %v186_v17  ;;  %v873_v17 = vld [vmem:[%s1278_s3 + $0xb0] ss:$0 sm:$0xff] }
0x1654   :  { %v627_v20 = vmul.f32 %v626_v19, %v1067_v37 }
0x1656   :  { %v628_v21 = vsub.f32 0.0, %v627_v20 }
0x1658   :  { %v629_v22 = vmul.f32 1.442695, %v628_v21 }
0x1659   :  { %v624_v23 = vpop.f32.mrf.mxu3 }
0x165a   :  { %930 = vpow2.f32 %v629_v22  ;;  %v874_v23 = vld [vmem:[%s1278_s3 + $0xb8] ss:$0 sm:$0xff] }
0x1660   :  { %v931_v24 = vpop.eup %930 }
0x1661   :  { %v631_v25 = vadd.f32 1.0, %v931_v24 }
0x1663   :  { %932 = vrcp.f32 %v631_v25 }
0x1669   :  { %v933_v26 = vpop.eup %932 }
0x166a   :  { %v633_v27 = vmul.f32 %v933_v26, %v1067_v37  ;;  %v655_v37 = vld [vmem:[%s1278_s3 + $0x18] sm:$0xff] }
0x166b   :  { %v657_v36 = vpack.c.bf16 %v655_v37, %v654_v35 }
0x166c   :  { %v634_v28 = vadd.f32 %v633_v27, %v1070_v46  ;;  %v652_v46 = vld [vmem:[%s1278_s3] sm:$0xff] }
0x166d   :  { %673 = vmatpush.bf16.msrb.mxu1 %v657_v36  ;;  %v656_v39 = vpack.c.bf16 %v653_v38, %v652_v46 }
0x166e   :  { %637 = vrot.lane.b32.xlu0 %v634_v28, %s969_s2  ;;  %v635_v30 = vmul.f32 %v634_v28, %v599_v8 }
0x1671   :  { %674 = vmatpush.bf16.msrb.mxu1 %v656_v39 }
0x1675   :  { %777 = vmatpush.bf16.msra.mxu1 %v764_v13 }
0x1679   :  { %778 = vmatpush.bf16.msra.mxu1 %v763_v16 }
0x16e0   :  { %v638_v29 = vpop.permute.xlu0 %637 }
0x16e1   :  { %v640_v33 = vmul.f32 %v638_v29, %v634_v28  ;;  %v875_v29 = vld [vmem:[%s1278_s3 + $0xc0] ss:$0 sm:$0xff]  ;;  %s971_s3 = smov [#allocation2]  }
0x16e2   :  { %s804_s23 = sshll.u32 %s971_s3, 4  ;;  %s805_s23 = int_to_ptr.vmem [resolvable:$true] %s804_s23 }
0x16e3   :  { %642 = vrot.lane.b32.xlu1 %v640_v33, %s970_s22 }
0x1755   :  { %v643_v31 = vpop.permute.xlu1 %642 }
0x1756   :  { %v645_v32 = vadd.f32 %v643_v31, %v635_v30 }
0x1758   :  { %934 = vtanh.f32 %v645_v32 }
0x175e   :  { %v935_v34 = vpop.eup %934 }
0x175f   :  { %648 = vrot.lane.b32.xlu2 %v935_v34, %s969_s2 }
0x17b9   :  { %v649_v40 = vpop.permute.xlu2 %648 }
0x17ba   :  { %v651_v41 = vmul.f32 %v649_v40, %v634_v28 }
0x17bc   :  { %v659_v42 = vpack.c.bf16 %v651_v41, %v651_v41 }
0x17be   :  { %662 = vrot.lane.b32.xlu0 %v659_v42, %s970_s22 }
0x1830   :  { %v663_v50 = vpop.permute.xlu0 %662 }
0x1831   :  { %854 = vmatmul.msk.bf16.vlgmr.msrb.gmra.mxu1 %vm195_vm6, %v663_v50 }
0x18ae   :  { %v676_v56 = vpop.f32.mrf.mxu1 }
0x18af   :  { %v677_v57 = vadd.f32 %v871_v55, %v676_v56 }
0x18b1   :  { %v680_v58 = vmax.f32 %v677_v57, 0.0 }
0x18b3   :  { %v688_v59 = vpack.c.bf16 %v680_v58, %v680_v58 }
0x18b5   :  { %855 = vmatmul.msk.bf16.vlgmr.msrb.gmra.mxu2 %vm195_vm6, %v688_v59 }
0x18b6   :  { %v678_v60 = vpop.f32.mrf.mxu1 }
0x1938   :  { %v702_v4 = vpop.f32.mrf.mxu2 }
0x1939   :  { %v703_v5 = vadd.f32 %v872_v3, %v702_v4 }
0x193b   :  { %v706_v6 = vmax.f32 %v703_v5, 0.0 }
0x193d   :  { %v714_v7 = vpack.c.bf16 %v706_v6, %v706_v6 }
0x193f   :  { %856 = vmatmul.msk.bf16.vlgmr.msrb.gmra.mxu3 %vm195_vm6, %v714_v7 }
0x1940   :  { %v704_v8 = vpop.f32.mrf.mxu2 }
0x19c2   :  { %v728_v18 = vpop.f32.mrf.mxu3 }
0x19c3   :  { %v729_v19 = vadd.f32 %v873_v17, %v728_v18 }
0x19c5   :  { %v732_v20 = vmax.f32 %v729_v19, 0.0 }
0x19c7   :  { %v740_v21 = vpack.c.bf16 %v732_v20, %v732_v20 }
0x19c9   :  { %857 = vmatmul.msk.bf16.vlgmr.msrb.gmra.mxu0 %vm195_vm6, %v740_v21 }
0x19ca   :  { %v730_v22 = vpop.f32.mrf.mxu3 }
0x1a46   :  { %v754_v24 = vpop.f32.mrf.mxu0 }
0x1a47   :  { %v755_v25 = vadd.f32 %v874_v23, %v754_v24 }
0x1a49   :  { %v758_v26 = vmax.f32 %v755_v25, 0.0 }
0x1a4b   :  { %v766_v27 = vpack.c.bf16 %v758_v26, %v758_v26 }
0x1a4d   :  { %858 = vmatmul.msk.bf16.vlgmr.msra.gmra.mxu1 %vm195_vm6, %v766_v27 }
0x1a4e   :  { %v756_v28 = vpop.f32.mrf.mxu0 }
0x1aca   :  { %v780_v33 = vpop.f32.mrf.mxu1 }
0x1acb   :  { %v781_v30 = vadd.f32 %v875_v29, %v780_v33 }
0x1acd   :  { %v785_v31 = vsel %vm784_vm7, %v781_v30, -inf }
0x1ace   :  { %786 = vmax.xlane.f32.xlu1 %v785_v31 }
0x1ad2   :  { %v782_v32 = vpop.f32.mrf.mxu1 }
0x1b41   :  { %v787_v34 = vpop.xlane.xlu1 %786 }
0x1b42   :  { %v788_v35 = vsub.f32 %v781_v30, %v787_v34 }
0x1b44   :  { %v789_v37 = vmul.f32 1.442695, %v788_v35 }
0x1b46   :  { %936 = vpow2.f32 %v789_v37 }
0x1b4c   :  { %v937_v46 = vpop.eup %936 }
0x1b4d   :  { %v791_v36 = vsel %vm784_vm7, %v937_v46, 0.0 }
0x1b4e   :  { %792 = vadd.xlane.f32.xlu2 %v791_v36 }
0x1bc1   :  { %v793_v38 = vpop.xlane.xlu2 %792 }
0x1bc2   :  { %938 = vlog2.f32 %v793_v38 }
0x1bc8   :  { %v939_v39 = vpop.eup %938 }
0x1bc9   :  { %v795_v40 = vmul.f32 0.6931472, %v939_v39 }
0x1bcb   :  { %v796_v41 = vadd.f32 %v795_v40, %v787_v34 }
0x1bcd   :  { %v797_v42 = vsub.f32 %v781_v30, %v796_v41 }
0x1bcf   :  { %798 = vst.msk [vmem:[#allocation2] sm:$0xff] %vm784_vm7, %v797_v42 }
0x1bd0   :  { %809 = dma.vmem_to_hbm [thread:$0]  %s805_s23, 128, %s807_s26, [#allocation3]  }
0x1bd1   :  { %964 = dma.done.wait [#allocation3], 128  }
0x1bd2   :  { %965 = vsyncadd [#allocation3], 4294967168 }
0x1bd3   :  { %814 = vsyncpa [#allocation3], 1 }

</bundles_post_ra>
